<compile_context>
chip_gen: v7x
topology: tpu7x:2x2x1
jax: 0.10.0
libtpu: 0.0.40
codegen_flags: <defaults>
</compile_context>

<pallas_src>
import functools

import jax
import jax.numpy as jnp
from jax.experimental import pallas as pl
from jax.experimental.pallas import tpu as pltpu


def _round_up(n, m):
    return ((n + m - 1) // m) * m


# New column order: i, f, o, g  (sigmoid gates contiguous, tanh gate last).
_GATE_PERM = (0, 1, 3, 2)  # new slot -> original PyTorch gate index (i, f, g, o)


def prepare_lstm_weights(w_ih, w_hh, b_ih, b_hh, w_fc, b_fc,
                         *, recurrence_dtype=jnp.bfloat16):
    """One-time weight re-layout (run once, outside the per-forward path).

    PyTorch layouts: w_ih (4H, I), w_hh (4H, H), b_* (4H,), w_fc (C, H), b_fc (C,).
    Returns (tensors, dims) with gate columns reordered to i,f,o,g, each gate starting
    at a 128-lane boundary, and the FC head padded to 128 output lanes.
    """
    H = w_hh.shape[1]
    I = w_ih.shape[1]
    C = w_fc.shape[0]
    Hp = _round_up(H, 128)
    Cp = _round_up(C, 128)

    def relayout_gate_cols(w_t):  # (K, 4H) -> (K, 4*Hp), zero-padded per gate, reordered
        out = jnp.zeros((w_t.shape[0], 4 * Hp), jnp.float32)
        for new_g, old_g in enumerate(_GATE_PERM):
            out = out.at[:, new_g * Hp:new_g * Hp + H].set(
                w_t[:, old_g * H:(old_g + 1) * H].astype(jnp.float32))
        return out

    wih = relayout_gate_cols(jnp.transpose(w_ih))                         # (I, 4Hp) f32
    whh = jnp.zeros((Hp, 4 * Hp), jnp.float32)
    whh = whh.at[:H, :].set(relayout_gate_cols(jnp.transpose(w_hh)))      # (Hp, 4Hp)
    whh = whh.astype(recurrence_dtype)                                    # bf16 by default
    bias = relayout_gate_cols((b_ih + b_hh).reshape(1, 4 * H))            # (1, 4Hp) f32
    wfc = jnp.zeros((Hp, Cp), jnp.float32).at[:H, :C].set(
        jnp.transpose(w_fc).astype(jnp.float32))                          # (Hp, Cp)
    bfc = jnp.zeros((1, Cp), jnp.float32).at[:, :C].set(b_fc.astype(jnp.float32))

    tensors = (wih, whh, bias, wfc, bfc)
    dims = {"I": I, "H": H, "Hp": Hp, "C": C, "Cp": Cp}
    return tensors, dims


def _lstm_kernel(x_ref, wih_ref, whh_ref, bias_ref, wfc_ref, bfc_ref, out_ref,
                 *, T, TB, I, Hp):
    f32 = jnp.float32
    bias = bias_ref[...].reshape(1, 1, 4 * Hp)          # (1, 1, 4Hp)
    x = x_ref[...]                                       # (T, TB, I) time-major

    # ---- Phase 1: input projection for ALL time steps, hoisted off the recurrence ----
    if I <= 4:
        # Rank-I outer product on the VPU: avoids an MXU weight push/drain that would sit
        # ahead of step 0 on the serial critical path (K=I=1 => ~0% contraction occupancy).
        x_proj = bias
        for k in range(I):
            x_proj = x_proj + x[:, :, k:k + 1] * wih_ref[k:k + 1, :].reshape(1, 1, 4 * Hp)
    else:
        x2 = x.reshape(T * TB, I)
        x_proj = (jnp.dot(x2, wih_ref[...], preferred_element_type=f32)
                  .reshape(T, TB, 4 * Hp) + bias)
    # x_proj: (T, TB, 4Hp) f32

    # ---- Phase 2: recurrence, fully unrolled (T tiny & static). Only h @ W_hh on MXU. ----
    whh = whh_ref[...]                                   # loop-invariant RHS, loaded once
    rec_dtype = whh.dtype                                # bf16 by default (all generations)
    h = jnp.zeros((TB, Hp), f32)
    c = jnp.zeros((TB, Hp), f32)

    for t in range(T):
        gates = x_proj[t] + jnp.dot(h.astype(rec_dtype), whh,
                                    preferred_element_type=f32)          # (TB, 4Hp) f32
        # Gate layout i,f,o,g: one sigmoid over 3 gates + one tanh (fewer EUP dispatches).
        sig = jax.nn.sigmoid(gates[:, :3 * Hp])
        i_g = sig[:, 0 * Hp:1 * Hp]
        f_g = sig[:, 1 * Hp:2 * Hp]
        o_g = sig[:, 2 * Hp:3 * Hp]
        g_g = jnp.tanh(gates[:, 3 * Hp:4 * Hp])
        c = f_g * c + i_g * g_g
        h = o_g * jnp.tanh(c)
    # Padded gate columns / whh rows / bias lanes are zero and c starts at 0, so the padded
    # lanes of c/h stay exactly 0; padded W_fc rows are zero so they never reach the logits.

    # ---- Phase 3: classifier head; Cp multiple of 128 -> unmasked lane-dense store ----
    out_ref[...] = (jnp.dot(h, wfc_ref[...], preferred_element_type=f32)
                    + bfc_ref[...]).astype(out_ref.dtype)


def lstm_model_forward(x, prepared, dims):
    """x: (B, T, I) -> logits (B, C).  `prepared, dims` from prepare_lstm_weights()."""
    B, T, I = x.shape
    assert I == dims["I"]
    Hp, C, Cp = dims["Hp"], dims["C"], dims["Cp"]
    wih, whh, bias, wfc, bfc = prepared

    # Batch tiling: up to 128 rows per tile (fills MXU rows on v6e/v7x); tiles run on the
    # "parallel" grid axis so v7x's second TensorCore / megacore can split them.
    if B >= 128:
        TB = 128
        Bp = _round_up(B, TB)
    else:
        Bp = _round_up(B, 8)
        TB = Bp
    n_tiles = Bp // TB

    # Time-major layout (layout plumbing only; weights were prepared once, outside).
    x_tm = jnp.transpose(x, (1, 0, 2)).astype(jnp.float32)     # (T, B, I)
    if Bp != B:
        x_tm = jnp.pad(x_tm, ((0, 0), (0, Bp - B), (0, 0)))    # zero rows are sliced off

    kernel = functools.partial(_lstm_kernel, T=T, TB=TB, I=I, Hp=Hp)

    out_padded = pl.pallas_call(
        kernel,
        out_shape=jax.ShapeDtypeStruct((Bp, Cp), jnp.float32),
        grid=(n_tiles,),
        in_specs=[
            pl.BlockSpec((T, TB, I), lambda b: (0, b, 0)),     # x (per batch tile)
            pl.BlockSpec((I, 4 * Hp), lambda b: (0, 0)),       # W_ih^T (broadcast)
            pl.BlockSpec((Hp, 4 * Hp), lambda b: (0, 0)),      # W_hh^T (broadcast)
            pl.BlockSpec((1, 4 * Hp), lambda b: (0, 0)),       # b_ih + b_hh
            pl.BlockSpec((Hp, Cp), lambda b: (0, 0)),          # W_fc^T
            pl.BlockSpec((1, Cp), lambda b: (0, 0)),           # b_fc
        ],
        out_specs=pl.BlockSpec((TB, Cp), lambda b: (b, 0)),
        compiler_params=pltpu.CompilerParams(dimension_semantics=("parallel",)),
    )(x_tm, wih, whh, bias, wfc, bfc)

    return out_padded[:B, :C]


def lstm_model_reference(x, w_ih, w_hh, b_ih, b_hh, w_fc, b_fc):
    """Pure-JAX reference replicating torch.nn.LSTM + Linear semantics."""
    B, T, I = x.shape
    H = w_hh.shape[1]

    def step(carry, x_t):
        h, c = carry
        gates = x_t @ w_ih.T + b_ih + h @ w_hh.T + b_hh
        i_g = jax.nn.sigmoid(gates[:, 0 * H:1 * H])
        f_g = jax.nn.sigmoid(gates[:, 1 * H:2 * H])
        g_g = jnp.tanh(gates[:, 2 * H:3 * H])
        o_g = jax.nn.sigmoid(gates[:, 3 * H:4 * H])
        c = f_g * c + i_g * g_g
        h = o_g * jnp.tanh(c)
        return (h, c), None

    h0 = jnp.zeros((B, H), jnp.float32)
    c0 = jnp.zeros((B, H), jnp.float32)
    (h_last, _), _ = jax.lax.scan(step, (h0, c0), jnp.transpose(x, (1, 0, 2)))
    return h_last @ w_fc.T + b_fc


if __name__ == "__main__":
    B, T, I = 8, 8, 1          # batch, sequence length, input_size (module: input_size=1)
    H = 64                     # hidden_size (module: 64)
    C = 4                      # num_classes stand-in

    key = jax.random.PRNGKey(0)
    ks = jax.random.split(key, 7)
    scale = 1.0 / jnp.sqrt(H * 1.0)
    x = jax.random.normal(ks[0], (B, T, I), jnp.float32)
    w_ih = jax.random.uniform(ks[1], (4 * H, I), jnp.float32, -scale, scale)
    w_hh = jax.random.uniform(ks[2], (4 * H, H), jnp.float32, -scale, scale)
    b_ih = jax.random.uniform(ks[3], (4 * H,), jnp.float32, -scale, scale)
    b_hh = jax.random.uniform(ks[4], (4 * H,), jnp.float32, -scale, scale)
    w_fc = jax.random.uniform(ks[5], (C, H), jnp.float32, -scale, scale)
    b_fc = jax.random.uniform(ks[6], (C,), jnp.float32, -scale, scale)

    ref = lstm_model_reference(x, w_ih, w_hh, b_ih, b_hh, w_fc, b_fc)

    # Default path: bf16 recurrence-weight operands (MXU-native on v5e/v6e/v7x);
    # gate/state math stays f32 -> looser tolerance by design.
    prep_bf16, dims = prepare_lstm_weights(w_ih, w_hh, b_ih, b_hh, w_fc, b_fc)
    out_bf16 = jax.block_until_ready(lstm_model_forward(x, prep_bf16, dims))
    assert out_bf16.shape == (B, C)
    assert jnp.allclose(out_bf16, ref, atol=1e-1, rtol=1e-1), "bf16 kernel mismatch"

    # f32 recurrence-weight path (tight tolerance vs the pure-JAX reference).
    prep_f32, dims_f32 = prepare_lstm_weights(w_ih, w_hh, b_ih, b_hh, w_fc, b_fc,
                                              recurrence_dtype=jnp.float32)
    out_f32 = jax.block_until_ready(lstm_model_forward(x, prep_f32, dims_f32))
    assert out_f32.shape == (B, C)
    assert jnp.allclose(out_f32, ref, atol=1e-5, rtol=1e-5), "f32 kernel mismatch"

    print("KERNEL_OK")
</pallas_src>

<mosaic_0001>
module attributes {stable_mosaic.version = 11 : i64} {
  func.func @_lstm_kernel(%arg0: i32, %arg1: memref<8x8x1xf32, #tpu.memory_space<vmem>>, %arg2: memref<1x512xf32, #tpu.memory_space<vmem>>, %arg3: memref<128x512xbf16, #tpu.memory_space<vmem>>, %arg4: memref<1x512xf32, #tpu.memory_space<vmem>>, %arg5: memref<128x128xf32, #tpu.memory_space<vmem>>, %arg6: memref<1x128xf32, #tpu.memory_space<vmem>>, %arg7: memref<8x128xf32, #tpu.memory_space<vmem>>) attributes {dimension_semantics = [#tpu.dimension_semantics<parallel>], iteration_bounds = array<i64: 1>, scalar_prefetch = 0 : i64, scratch_operands = 0 : i64, tpu.core_type = #tpu.core_type<tc>, window_params = [{transform_indices = @transform_0, window_bounds = array<i64: 8, 8, 1>}, {pipeline_mode = #tpu.pipeline_mode<synchronous>, transform_indices = @transform_1, window_bounds = array<i64: 1, 512>}, {pipeline_mode = #tpu.pipeline_mode<synchronous>, transform_indices = @transform_2, window_bounds = array<i64: 128, 512>}, {pipeline_mode = #tpu.pipeline_mode<synchronous>, transform_indices = @transform_3, window_bounds = array<i64: 1, 512>}, {pipeline_mode = #tpu.pipeline_mode<synchronous>, transform_indices = @transform_4, window_bounds = array<i64: 128, 128>}, {pipeline_mode = #tpu.pipeline_mode<synchronous>, transform_indices = @transform_5, window_bounds = array<i64: 1, 128>}, {transform_indices = @transform_6, window_bounds = array<i64: 8, 128>}]} {
    %c0 = arith.constant 0 : index
    %c0_0 = arith.constant 0 : index
    %0 = vector.load %arg4[%c0, %c0_0] : memref<1x512xf32, #tpu.memory_space<vmem>>, vector<1x512xf32>
    %1 = vector.shape_cast %0 : vector<1x512xf32> to vector<1x1x512xf32>
    %c0_1 = arith.constant 0 : index
    %c0_2 = arith.constant 0 : index
    %c0_3 = arith.constant 0 : index
    %2 = vector.load %arg1[%c0_1, %c0_2, %c0_3] : memref<8x8x1xf32, #tpu.memory_space<vmem>>, vector<8x8x1xf32>
    %c0_4 = arith.constant 0 : index
    %c0_5 = arith.constant 0 : index
    %3 = vector.load %arg2[%c0_4, %c0_5] : memref<1x512xf32, #tpu.memory_space<vmem>>, vector<1x512xf32>
    %4 = vector.shape_cast %3 : vector<1x512xf32> to vector<1x1x512xf32>
    %5 = vector.broadcast %2 : vector<8x8x1xf32> to vector<8x8x512xf32>
    %6 = vector.broadcast %4 : vector<1x1x512xf32> to vector<8x8x512xf32>
    %7 = arith.mulf %5, %6 : vector<8x8x512xf32>
    %8 = vector.broadcast %1 : vector<1x1x512xf32> to vector<8x8x512xf32>
    %9 = arith.addf %8, %7 : vector<8x8x512xf32>
    %c0_6 = arith.constant 0 : index
    %c0_7 = arith.constant 0 : index
    %10 = vector.load %arg3[%c0_6, %c0_7] : memref<128x512xbf16, #tpu.memory_space<vmem>>, vector<128x512xbf16>
    %cst = arith.constant 0.000000e+00 : f32
    %11 = vector.broadcast %cst : f32 to vector<8x128xf32>
    %cst_8 = arith.constant 0.000000e+00 : f32
    %12 = vector.broadcast %cst_8 : f32 to vector<8x128xf32>
    %13 = vector.extract_strided_slice %9 {offsets = [0, 0, 0], sizes = [1, 8, 512], strides = [1, 1, 1]} : vector<8x8x512xf32> to vector<1x8x512xf32>
    %14 = vector.shape_cast %13 : vector<1x8x512xf32> to vector<8x512xf32>
    %15 = arith.truncf %11 : vector<8x128xf32> to vector<8x128xbf16>
    %cst_9 = arith.constant dense<0.000000e+00> : vector<8x512xf32>
    %16 = tpu.matmul %15, %10, %cst_9 {dimension_numbers = #tpu.dot_dimension_numbers<[1], [0], [0], [1], [0, 0, 1, 1], [], []>} : vector<8x128xbf16>, vector<128x512xbf16>, vector<8x512xf32> -> vector<8x512xf32>
    %17 = arith.addf %14, %16 : vector<8x512xf32>
    %18 = vector.extract_strided_slice %17 {offsets = [0, 0], sizes = [8, 384], strides = [1, 1]} : vector<8x512xf32> to vector<8x384xf32>
    %19 = arith.negf %18 : vector<8x384xf32>
    %20 = math.exp %19 : vector<8x384xf32>
    %cst_10 = arith.constant 1.000000e+00 : f32
    %21 = vector.broadcast %cst_10 : f32 to vector<8x384xf32>
    %22 = arith.addf %21, %20 : vector<8x384xf32>
    %23 = arith.divf %21, %22 : vector<8x384xf32>
    %24 = vector.extract_strided_slice %23 {offsets = [0, 0], sizes = [8, 128], strides = [1, 1]} : vector<8x384xf32> to vector<8x128xf32>
    %25 = vector.extract_strided_slice %23 {offsets = [0, 128], sizes = [8, 128], strides = [1, 1]} : vector<8x384xf32> to vector<8x128xf32>
    %26 = vector.extract_strided_slice %23 {offsets = [0, 256], sizes = [8, 128], strides = [1, 1]} : vector<8x384xf32> to vector<8x128xf32>
    %27 = vector.extract_strided_slice %17 {offsets = [0, 384], sizes = [8, 128], strides = [1, 1]} : vector<8x512xf32> to vector<8x128xf32>
    %28 = math.tanh %27 : vector<8x128xf32>
    %29 = arith.mulf %25, %12 : vector<8x128xf32>
    %30 = arith.mulf %24, %28 : vector<8x128xf32>
    %31 = arith.addf %29, %30 : vector<8x128xf32>
    %32 = math.tanh %31 : vector<8x128xf32>
    %33 = arith.mulf %26, %32 : vector<8x128xf32>
    %34 = vector.extract_strided_slice %9 {offsets = [1, 0, 0], sizes = [1, 8, 512], strides = [1, 1, 1]} : vector<8x8x512xf32> to vector<1x8x512xf32>
    %35 = vector.shape_cast %34 : vector<1x8x512xf32> to vector<8x512xf32>
    %36 = arith.truncf %33 : vector<8x128xf32> to vector<8x128xbf16>
    %cst_11 = arith.constant dense<0.000000e+00> : vector<8x512xf32>
    %37 = tpu.matmul %36, %10, %cst_11 {dimension_numbers = #tpu.dot_dimension_numbers<[1], [0], [0], [1], [0, 0, 1, 1], [], []>} : vector<8x128xbf16>, vector<128x512xbf16>, vector<8x512xf32> -> vector<8x512xf32>
    %38 = arith.addf %35, %37 : vector<8x512xf32>
    %39 = vector.extract_strided_slice %38 {offsets = [0, 0], sizes = [8, 384], strides = [1, 1]} : vector<8x512xf32> to vector<8x384xf32>
    %40 = arith.negf %39 : vector<8x384xf32>
    %41 = math.exp %40 : vector<8x384xf32>
    %cst_12 = arith.constant 1.000000e+00 : f32
    %42 = vector.broadcast %cst_12 : f32 to vector<8x384xf32>
    %43 = arith.addf %42, %41 : vector<8x384xf32>
    %44 = arith.divf %42, %43 : vector<8x384xf32>
    %45 = vector.extract_strided_slice %44 {offsets = [0, 0], sizes = [8, 128], strides = [1, 1]} : vector<8x384xf32> to vector<8x128xf32>
    %46 = vector.extract_strided_slice %44 {offsets = [0, 128], sizes = [8, 128], strides = [1, 1]} : vector<8x384xf32> to vector<8x128xf32>
    %47 = vector.extract_strided_slice %44 {offsets = [0, 256], sizes = [8, 128], strides = [1, 1]} : vector<8x384xf32> to vector<8x128xf32>
    %48 = vector.extract_strided_slice %38 {offsets = [0, 384], sizes = [8, 128], strides = [1, 1]} : vector<8x512xf32> to vector<8x128xf32>
    %49 = math.tanh %48 : vector<8x128xf32>
    %50 = arith.mulf %46, %31 : vector<8x128xf32>
    %51 = arith.mulf %45, %49 : vector<8x128xf32>
    %52 = arith.addf %50, %51 : vector<8x128xf32>
    %53 = math.tanh %52 : vector<8x128xf32>
    %54 = arith.mulf %47, %53 : vector<8x128xf32>
    %55 = vector.extract_strided_slice %9 {offsets = [2, 0, 0], sizes = [1, 8, 512], strides = [1, 1, 1]} : vector<8x8x512xf32> to vector<1x8x512xf32>
    %56 = vector.shape_cast %55 : vector<1x8x512xf32> to vector<8x512xf32>
    %57 = arith.truncf %54 : vector<8x128xf32> to vector<8x128xbf16>
    %cst_13 = arith.constant dense<0.000000e+00> : vector<8x512xf32>
    %58 = tpu.matmul %57, %10, %cst_13 {dimension_numbers = #tpu.dot_dimension_numbers<[1], [0], [0], [1], [0, 0, 1, 1], [], []>} : vector<8x128xbf16>, vector<128x512xbf16>, vector<8x512xf32> -> vector<8x512xf32>
    %59 = arith.addf %56, %58 : vector<8x512xf32>
    %60 = vector.extract_strided_slice %59 {offsets = [0, 0], sizes = [8, 384], strides = [1, 1]} : vector<8x512xf32> to vector<8x384xf32>
    %61 = arith.negf %60 : vector<8x384xf32>
    %62 = math.exp %61 : vector<8x384xf32>
    %cst_14 = arith.constant 1.000000e+00 : f32
    %63 = vector.broadcast %cst_14 : f32 to vector<8x384xf32>
    %64 = arith.addf %63, %62 : vector<8x384xf32>
    %65 = arith.divf %63, %64 : vector<8x384xf32>
    %66 = vector.extract_strided_slice %65 {offsets = [0, 0], sizes = [8, 128], strides = [1, 1]} : vector<8x384xf32> to vector<8x128xf32>
    %67 = vector.extract_strided_slice %65 {offsets = [0, 128], sizes = [8, 128], strides = [1, 1]} : vector<8x384xf32> to vector<8x128xf32>
    %68 = vector.extract_strided_slice %65 {offsets = [0, 256], sizes = [8, 128], strides = [1, 1]} : vector<8x384xf32> to vector<8x128xf32>
    %69 = vector.extract_strided_slice %59 {offsets = [0, 384], sizes = [8, 128], strides = [1, 1]} : vector<8x512xf32> to vector<8x128xf32>
    %70 = math.tanh %69 : vector<8x128xf32>
    %71 = arith.mulf %67, %52 : vector<8x128xf32>
    %72 = arith.mulf %66, %70 : vector<8x128xf32>
    %73 = arith.addf %71, %72 : vector<8x128xf32>
    %74 = math.tanh %73 : vector<8x128xf32>
    %75 = arith.mulf %68, %74 : vector<8x128xf32>
    %76 = vector.extract_strided_slice %9 {offsets = [3, 0, 0], sizes = [1, 8, 512], strides = [1, 1, 1]} : vector<8x8x512xf32> to vector<1x8x512xf32>
    %77 = vector.shape_cast %76 : vector<1x8x512xf32> to vector<8x512xf32>
    %78 = arith.truncf %75 : vector<8x128xf32> to vector<8x128xbf16>
    %cst_15 = arith.constant dense<0.000000e+00> : vector<8x512xf32>
    %79 = tpu.matmul %78, %10, %cst_15 {dimension_numbers = #tpu.dot_dimension_numbers<[1], [0], [0], [1], [0, 0, 1, 1], [], []>} : vector<8x128xbf16>, vector<128x512xbf16>, vector<8x512xf32> -> vector<8x512xf32>
    %80 = arith.addf %77, %79 : vector<8x512xf32>
    %81 = vector.extract_strided_slice %80 {offsets = [0, 0], sizes = [8, 384], strides = [1, 1]} : vector<8x512xf32> to vector<8x384xf32>
    %82 = arith.negf %81 : vector<8x384xf32>
    %83 = math.exp %82 : vector<8x384xf32>
    %cst_16 = arith.constant 1.000000e+00 : f32
    %84 = vector.broadcast %cst_16 : f32 to vector<8x384xf32>
    %85 = arith.addf %84, %83 : vector<8x384xf32>
    %86 = arith.divf %84, %85 : vector<8x384xf32>
    %87 = vector.extract_strided_slice %86 {offsets = [0, 0], sizes = [8, 128], strides = [1, 1]} : vector<8x384xf32> to vector<8x128xf32>
    %88 = vector.extract_strided_slice %86 {offsets = [0, 128], sizes = [8, 128], strides = [1, 1]} : vector<8x384xf32> to vector<8x128xf32>
    %89 = vector.extract_strided_slice %86 {offsets = [0, 256], sizes = [8, 128], strides = [1, 1]} : vector<8x384xf32> to vector<8x128xf32>
    %90 = vector.extract_strided_slice %80 {offsets = [0, 384], sizes = [8, 128], strides = [1, 1]} : vector<8x512xf32> to vector<8x128xf32>
    %91 = math.tanh %90 : vector<8x128xf32>
    %92 = arith.mulf %88, %73 : vector<8x128xf32>
    %93 = arith.mulf %87, %91 : vector<8x128xf32>
    %94 = arith.addf %92, %93 : vector<8x128xf32>
    %95 = math.tanh %94 : vector<8x128xf32>
    %96 = arith.mulf %89, %95 : vector<8x128xf32>
    %97 = vector.extract_strided_slice %9 {offsets = [4, 0, 0], sizes = [1, 8, 512], strides = [1, 1, 1]} : vector<8x8x512xf32> to vector<1x8x512xf32>
    %98 = vector.shape_cast %97 : vector<1x8x512xf32> to vector<8x512xf32>
    %99 = arith.truncf %96 : vector<8x128xf32> to vector<8x128xbf16>
    %cst_17 = arith.constant dense<0.000000e+00> : vector<8x512xf32>
    %100 = tpu.matmul %99, %10, %cst_17 {dimension_numbers = #tpu.dot_dimension_numbers<[1], [0], [0], [1], [0, 0, 1, 1], [], []>} : vector<8x128xbf16>, vector<128x512xbf16>, vector<8x512xf32> -> vector<8x512xf32>
    %101 = arith.addf %98, %100 : vector<8x512xf32>
    %102 = vector.extract_strided_slice %101 {offsets = [0, 0], sizes = [8, 384], strides = [1, 1]} : vector<8x512xf32> to vector<8x384xf32>
    %103 = arith.negf %102 : vector<8x384xf32>
    %104 = math.exp %103 : vector<8x384xf32>
    %cst_18 = arith.constant 1.000000e+00 : f32
    %105 = vector.broadcast %cst_18 : f32 to vector<8x384xf32>
    %106 = arith.addf %105, %104 : vector<8x384xf32>
    %107 = arith.divf %105, %106 : vector<8x384xf32>
    %108 = vector.extract_strided_slice %107 {offsets = [0, 0], sizes = [8, 128], strides = [1, 1]} : vector<8x384xf32> to vector<8x128xf32>
    %109 = vector.extract_strided_slice %107 {offsets = [0, 128], sizes = [8, 128], strides = [1, 1]} : vector<8x384xf32> to vector<8x128xf32>
    %110 = vector.extract_strided_slice %107 {offsets = [0, 256], sizes = [8, 128], strides = [1, 1]} : vector<8x384xf32> to vector<8x128xf32>
    %111 = vector.extract_strided_slice %101 {offsets = [0, 384], sizes = [8, 128], strides = [1, 1]} : vector<8x512xf32> to vector<8x128xf32>
    %112 = math.tanh %111 : vector<8x128xf32>
    %113 = arith.mulf %109, %94 : vector<8x128xf32>
    %114 = arith.mulf %108, %112 : vector<8x128xf32>
    %115 = arith.addf %113, %114 : vector<8x128xf32>
    %116 = math.tanh %115 : vector<8x128xf32>
    %117 = arith.mulf %110, %116 : vector<8x128xf32>
    %118 = vector.extract_strided_slice %9 {offsets = [5, 0, 0], sizes = [1, 8, 512], strides = [1, 1, 1]} : vector<8x8x512xf32> to vector<1x8x512xf32>
    %119 = vector.shape_cast %118 : vector<1x8x512xf32> to vector<8x512xf32>
    %120 = arith.truncf %117 : vector<8x128xf32> to vector<8x128xbf16>
    %cst_19 = arith.constant dense<0.000000e+00> : vector<8x512xf32>
    %121 = tpu.matmul %120, %10, %cst_19 {dimension_numbers = #tpu.dot_dimension_numbers<[1], [0], [0], [1], [0, 0, 1, 1], [], []>} : vector<8x128xbf16>, vector<128x512xbf16>, vector<8x512xf32> -> vector<8x512xf32>
    %122 = arith.addf %119, %121 : vector<8x512xf32>
    %123 = vector.extract_strided_slice %122 {offsets = [0, 0], sizes = [8, 384], strides = [1, 1]} : vector<8x512xf32> to vector<8x384xf32>
    %124 = arith.negf %123 : vector<8x384xf32>
    %125 = math.exp %124 : vector<8x384xf32>
    %cst_20 = arith.constant 1.000000e+00 : f32
    %126 = vector.broadcast %cst_20 : f32 to vector<8x384xf32>
    %127 = arith.addf %126, %125 : vector<8x384xf32>
    %128 = arith.divf %126, %127 : vector<8x384xf32>
    %129 = vector.extract_strided_slice %128 {offsets = [0, 0], sizes = [8, 128], strides = [1, 1]} : vector<8x384xf32> to vector<8x128xf32>
    %130 = vector.extract_strided_slice %128 {offsets = [0, 128], sizes = [8, 128], strides = [1, 1]} : vector<8x384xf32> to vector<8x128xf32>
    %131 = vector.extract_strided_slice %128 {offsets = [0, 256], sizes = [8, 128], strides = [1, 1]} : vector<8x384xf32> to vector<8x128xf32>
    %132 = vector.extract_strided_slice %122 {offsets = [0, 384], sizes = [8, 128], strides = [1, 1]} : vector<8x512xf32> to vector<8x128xf32>
    %133 = math.tanh %132 : vector<8x128xf32>
    %134 = arith.mulf %130, %115 : vector<8x128xf32>
    %135 = arith.mulf %129, %133 : vector<8x128xf32>
    %136 = arith.addf %134, %135 : vector<8x128xf32>
    %137 = math.tanh %136 : vector<8x128xf32>
    %138 = arith.mulf %131, %137 : vector<8x128xf32>
    %139 = vector.extract_strided_slice %9 {offsets = [6, 0, 0], sizes = [1, 8, 512], strides = [1, 1, 1]} : vector<8x8x512xf32> to vector<1x8x512xf32>
    %140 = vector.shape_cast %139 : vector<1x8x512xf32> to vector<8x512xf32>
    %141 = arith.truncf %138 : vector<8x128xf32> to vector<8x128xbf16>
    %cst_21 = arith.constant dense<0.000000e+00> : vector<8x512xf32>
    %142 = tpu.matmul %141, %10, %cst_21 {dimension_numbers = #tpu.dot_dimension_numbers<[1], [0], [0], [1], [0, 0, 1, 1], [], []>} : vector<8x128xbf16>, vector<128x512xbf16>, vector<8x512xf32> -> vector<8x512xf32>
    %143 = arith.addf %140, %142 : vector<8x512xf32>
    %144 = vector.extract_strided_slice %143 {offsets = [0, 0], sizes = [8, 384], strides = [1, 1]} : vector<8x512xf32> to vector<8x384xf32>
    %145 = arith.negf %144 : vector<8x384xf32>
    %146 = math.exp %145 : vector<8x384xf32>
    %cst_22 = arith.constant 1.000000e+00 : f32
    %147 = vector.broadcast %cst_22 : f32 to vector<8x384xf32>
    %148 = arith.addf %147, %146 : vector<8x384xf32>
    %149 = arith.divf %147, %148 : vector<8x384xf32>
    %150 = vector.extract_strided_slice %149 {offsets = [0, 0], sizes = [8, 128], strides = [1, 1]} : vector<8x384xf32> to vector<8x128xf32>
    %151 = vector.extract_strided_slice %149 {offsets = [0, 128], sizes = [8, 128], strides = [1, 1]} : vector<8x384xf32> to vector<8x128xf32>
    %152 = vector.extract_strided_slice %149 {offsets = [0, 256], sizes = [8, 128], strides = [1, 1]} : vector<8x384xf32> to vector<8x128xf32>
    %153 = vector.extract_strided_slice %143 {offsets = [0, 384], sizes = [8, 128], strides = [1, 1]} : vector<8x512xf32> to vector<8x128xf32>
    %154 = math.tanh %153 : vector<8x128xf32>
    %155 = arith.mulf %151, %136 : vector<8x128xf32>
    %156 = arith.mulf %150, %154 : vector<8x128xf32>
    %157 = arith.addf %155, %156 : vector<8x128xf32>
    %158 = math.tanh %157 : vector<8x128xf32>
    %159 = arith.mulf %152, %158 : vector<8x128xf32>
    %160 = vector.extract_strided_slice %9 {offsets = [7, 0, 0], sizes = [1, 8, 512], strides = [1, 1, 1]} : vector<8x8x512xf32> to vector<1x8x512xf32>
    %161 = vector.shape_cast %160 : vector<1x8x512xf32> to vector<8x512xf32>
    %162 = arith.truncf %159 : vector<8x128xf32> to vector<8x128xbf16>
    %cst_23 = arith.constant dense<0.000000e+00> : vector<8x512xf32>
    %163 = tpu.matmul %162, %10, %cst_23 {dimension_numbers = #tpu.dot_dimension_numbers<[1], [0], [0], [1], [0, 0, 1, 1], [], []>} : vector<8x128xbf16>, vector<128x512xbf16>, vector<8x512xf32> -> vector<8x512xf32>
    %164 = arith.addf %161, %163 : vector<8x512xf32>
    %165 = vector.extract_strided_slice %164 {offsets = [0, 0], sizes = [8, 384], strides = [1, 1]} : vector<8x512xf32> to vector<8x384xf32>
    %166 = arith.negf %165 : vector<8x384xf32>
    %167 = math.exp %166 : vector<8x384xf32>
    %cst_24 = arith.constant 1.000000e+00 : f32
    %168 = vector.broadcast %cst_24 : f32 to vector<8x384xf32>
    %169 = arith.addf %168, %167 : vector<8x384xf32>
    %170 = arith.divf %168, %169 : vector<8x384xf32>
    %171 = vector.extract_strided_slice %170 {offsets = [0, 0], sizes = [8, 128], strides = [1, 1]} : vector<8x384xf32> to vector<8x128xf32>
    %172 = vector.extract_strided_slice %170 {offsets = [0, 128], sizes = [8, 128], strides = [1, 1]} : vector<8x384xf32> to vector<8x128xf32>
    %173 = vector.extract_strided_slice %170 {offsets = [0, 256], sizes = [8, 128], strides = [1, 1]} : vector<8x384xf32> to vector<8x128xf32>
    %174 = vector.extract_strided_slice %164 {offsets = [0, 384], sizes = [8, 128], strides = [1, 1]} : vector<8x512xf32> to vector<8x128xf32>
    %175 = math.tanh %174 : vector<8x128xf32>
    %176 = arith.mulf %172, %157 : vector<8x128xf32>
    %177 = arith.mulf %171, %175 : vector<8x128xf32>
    %178 = arith.addf %176, %177 : vector<8x128xf32>
    %179 = math.tanh %178 : vector<8x128xf32>
    %180 = arith.mulf %173, %179 : vector<8x128xf32>
    %c0_25 = arith.constant 0 : index
    %c0_26 = arith.constant 0 : index
    %181 = vector.load %arg5[%c0_25, %c0_26] : memref<128x128xf32, #tpu.memory_space<vmem>>, vector<128x128xf32>
    %cst_27 = arith.constant dense<0.000000e+00> : vector<8x128xf32>
    %182 = tpu.matmul %180, %181, %cst_27 {dimension_numbers = #tpu.dot_dimension_numbers<[1], [0], [0], [1], [0, 0, 1, 1], [], []>} : vector<8x128xf32>, vector<128x128xf32>, vector<8x128xf32> -> vector<8x128xf32>
    %c0_28 = arith.constant 0 : index
    %c0_29 = arith.constant 0 : index
    %183 = vector.load %arg6[%c0_28, %c0_29] : memref<1x128xf32, #tpu.memory_space<vmem>>, vector<1x128xf32>
    %184 = vector.broadcast %183 : vector<1x128xf32> to vector<8x128xf32>
    %185 = arith.addf %182, %184 : vector<8x128xf32>
    %c0_30 = arith.constant 0 : index
    %c0_31 = arith.constant 0 : index
    %186 = vector.load %arg7[%c0_30, %c0_31] : memref<8x128xf32, #tpu.memory_space<vmem>>, vector<8x128xf32>
    tpu.vector_store %arg7[%c0_30, %c0_31], %185 {strides = array<i32>} : memref<8x128xf32, #tpu.memory_space<vmem>>, vector<8x128xf32>,
    return
  }
  func.func @transform_0(%arg0: i32) -> (i32, i32, i32) {
    %c0_i32 = arith.constant 0 : i32
    %c0_i32_0 = arith.constant 0 : i32
    %c0_i32_1 = arith.constant 0 : i32
    return %c0_i32, %arg0, %c0_i32_0 : i32, i32, i32
  }
  func.func @transform_1(%arg0: i32) -> (i32, i32) {
    %c0_i32 = arith.constant 0 : i32
    %c0_i32_0 = arith.constant 0 : i32
    %c0_i32_1 = arith.constant 0 : i32
    return %c0_i32, %c0_i32_0 : i32, i32
  }
  func.func @transform_2(%arg0: i32) -> (i32, i32) {
    %c0_i32 = arith.constant 0 : i32
    %c0_i32_0 = arith.constant 0 : i32
    %c0_i32_1 = arith.constant 0 : i32
    return %c0_i32, %c0_i32_0 : i32, i32
  }
  func.func @transform_3(%arg0: i32) -> (i32, i32) {
    %c0_i32 = arith.constant 0 : i32
    %c0_i32_0 = arith.constant 0 : i32
    %c0_i32_1 = arith.constant 0 : i32
    return %c0_i32, %c0_i32_0 : i32, i32
  }
  func.func @transform_4(%arg0: i32) -> (i32, i32) {
    %c0_i32 = arith.constant 0 : i32
    %c0_i32_0 = arith.constant 0 : i32
    %c0_i32_1 = arith.constant 0 : i32
    return %c0_i32, %c0_i32_0 : i32, i32
  }
  func.func @transform_5(%arg0: i32) -> (i32, i32) {
    %c0_i32 = arith.constant 0 : i32
    %c0_i32_0 = arith.constant 0 : i32
    %c0_i32_1 = arith.constant 0 : i32
    return %c0_i32, %c0_i32_0 : i32, i32
  }
  func.func @transform_6(%arg0: i32) -> (i32, i32) {
    %c0_i32 = arith.constant 0 : i32
    %c0_i32_0 = arith.constant 0 : i32
    return %arg0, %c0_i32 : i32, i32
  }
}

</mosaic_0001>

<bundles_post_ra>
// kernel: tpu_custom_call.1
= control target key start
LH: loop header
LB: loop body
LE: loop exit
PB: predicated region body
PF: predicated region fallthrough
CT: control target
= control target key end

     0   :  { %11 = vsyncpa [#allocation3], 0  ;;  %s2412_s0 = inlined_call_operand.vmem [shape: f32[8,8,1], index: 0, kind: input, shape index: {}]   ;;  %s2413_s1 = inlined_call_operand.vmem [shape: f32[1,512], index: 1, kind: input, shape index: {}]   ;;  %s2414_s2 = inlined_call_operand.hbm [shape: bf16[128,512], index: 2, kind: input, shape index: {}]   ;;  %s2415_s3 = inlined_call_operand.vmem [shape: f32[1,512], index: 3, kind: input, shape index: {}]   ;;  %s2416_s4 = inlined_call_operand.hbm [shape: f32[128,128], index: 4, kind: input, shape index: {}]   ;;  %s2417_s5 = inlined_call_operand.vmem [shape: f32[1,128], index: 5, kind: input, shape index: {}]   ;;  %s2418_s6 = inlined_call_operand.hbm [shape: f32[8,128], index: 6, kind: output, shape index: {}]  }
   0x1   :  { %12 = vsyncpa [#allocation6], 0 }
   0x2   :  { %13 = vsyncpa [#allocation4], 0  ;;  %s1824_s21 = smov [#allocation2]   ;;  %s1752_s25 = scalar_lea.hbm %s2414_s2, 4096 }
   0x3   :  { %s23_s22 = sshll.u32 %s1824_s21, 4  ;;  %p1753_p0 = scmp.ne.s32.totalorder %s2414_s2, %s1752_s25  ;;  %s24_s22 = int_to_ptr.vmem [resolvable:$true] %s23_s22 }
   0x4   :  { %p1756_p1 = scmp.lt.u32.totalorder %s1752_s25, %s2414_s2 }
   0x6   :  { %p1758_p2 = pnand %p1756_p1, %p1753_p0 }
   0x8   :  { %1761 = shalt.err (!%p1758_p2)
}
   0x9   :  { %s1762_s30 = scalar_lea.vmem %s24_s22, 4096  ;;  %p1767_p4 = scmp.lt.s32.totalorder %s24_s22, %s24_s22 }
   0xa   :  { %p1763_p3 = scmp.ne.s32.totalorder %s24_s22, %s1762_s30  ;;  %p1768_p5 = scmp.lt.s32.totalorder %s1762_s30, %s1762_s30 }
   0xc   :  { %p1769_p6 = por %p1768_p5, %p1767_p4 }
   0xe   :  { %p1770_p7 = pnand %p1769_p6, %p1763_p3 }
  0x10   :  { %1773 = shalt.err (!%p1770_p7)
}
  0x11   :  { %s1825_s7 = smov 256   ;;  %s1826_s8 = smov 16  }
  0x12   :  { %29 = dma.hbm_to_vmem [thread:$0]  %s2414_s2, 4096, %s24_s22, [#allocation3], %s1825_s7, %s1825_s7, %s1826_s8  }
  0x13   :  { %s1827_s11 = smov [#allocation5]   ;;  %s1774_s15 = scalar_lea.hbm %s2416_s4, 2048 }
  0x14   :  { %s37_s12 = sshll.u32 %s1827_s11, 4  ;;  %p1775_p8 = scmp.ne.s32.totalorder %s2416_s4, %s1774_s15  ;;  %s38_s12 = int_to_ptr.vmem [resolvable:$true] %s37_s12 }
  0x15   :  { %p1778_p9 = scmp.lt.u32.totalorder %s1774_s15, %s2416_s4 }
  0x17   :  { %p1780_p10 = pnand %p1778_p9, %p1775_p8 }
  0x19   :  { %1783 = shalt.err (!%p1780_p10)
}
  0x1a   :  { %s1784_s20 = scalar_lea.vmem %s38_s12, 2048  ;;  %p1789_p12 = scmp.lt.s32.totalorder %s38_s12, %s38_s12 }
  0x1b   :  { %p1785_p11 = scmp.ne.s32.totalorder %s38_s12, %s1784_s20  ;;  %p1790_p13 = scmp.lt.s32.totalorder %s1784_s20, %s1784_s20 }
  0x1d   :  { %p1791_p0 = por %p1790_p13, %p1789_p12 }
  0x1f   :  { %p1792_p1 = pnand %p1791_p0, %p1785_p11 }
  0x21   :  { %1795 = shalt.err (!%p1792_p1)
}
  0x22   :  { %s1828_s2 = smov 128   ;;  %s1829_s21 = smov 8  }
  0x23   :  { %43 = dma.hbm_to_vmem [thread:$0]  %s2416_s4, 2048, %s38_s12, [#allocation6], %s1828_s2, %s1828_s2, %s1829_s21  }
  0x24   :  { %1818 = dma.done.wait [#allocation3], 4096  }
  0x25   :  { %1819 = vsyncadd [#allocation3], 4294963200 }
  0x26   :  { %1820 = dma.done.wait [#allocation6], 2048  }
  0x27   :  { %1821 = vsyncadd [#allocation6], 4294965248  ;;  %v1830_v0 = vmov 0   ;;  %v1898_v1 = vld [vmem:[#allocation2 + $0x4] ss:$16 sps:$4 sm:$0xff]   ;;  %v55_v28 = vld [vmem:[%s2412_s0 + $0x8] sm:$0xff]  ;;  %v104_v37 = vlaneseq }
  0x28   :  { %433 = vmatprep.mubr.bf16.mxu0 %v1830_v0  ;;  %474 = vmatprep.mubr.bf16.mxu1 %v1830_v0  ;;  %v1900_v2 = vld [vmem:[#allocation2 + $0xc] ss:$16 sps:$4 sm:$0xff]   ;;  %v1903_v3 = vld [vmem:[#allocation2] ss:$16 sps:$4 sm:$0xff]   ;;  %v1905_v4 = vld [vmem:[#allocation2 + $0x8] ss:$16 sps:$4 sm:$0xff]  }
  0x29   :  { %1542 = vset.pattern.permute.xlu0 %v1830_v0  ;;  %1543 = vset.pattern.permute.xlu1 %v1830_v0  ;;  %v1908_v5 = vld [vmem:[#allocation2 + $0x24] ss:$16 sps:$4 sm:$0xff]   ;;  %v1912_v6 = vld [vmem:[#allocation2 + $0x2c] ss:$16 sps:$4 sm:$0xff]   ;;  %v1914_v7 = vld [vmem:[#allocation2 + $0x20] ss:$16 sps:$4 sm:$0xff]  }
  0x2a   :  { %401 = vmatprep.subr.bf16.mxu0 %v1898_v1  ;;  %442 = vmatprep.subr.bf16.mxu1 %v1900_v2  ;;  %v1917_v8 = vld [vmem:[#allocation2 + $0x28] ss:$16 sps:$4 sm:$0xff]   ;;  %v1920_v9 = vld [vmem:[#allocation2 + $0x44] ss:$16 sps:$4 sm:$0xff]   ;;  %v1922_v10 = vld [vmem:[#allocation2 + $0x4c] ss:$16 sps:$4 sm:$0xff]  }
  0x2b   :  { %402 = vmatpush1.bf16.msra.mxu0 %v1903_v3  ;;  %443 = vmatpush1.bf16.msra.mxu1 %v1905_v4  ;;  %v1924_v11 = vld [vmem:[#allocation2 + $0x40] ss:$16 sps:$4 sm:$0xff]   ;;  %v1926_v12 = vld [vmem:[#allocation2 + $0x48] ss:$16 sps:$4 sm:$0xff]   ;;  %v1930_v13 = vld [vmem:[#allocation2 + $0x64] ss:$16 sps:$4 sm:$0xff]  }
  0x2c   :  { %403 = vmatprep.subr.bf16.mxu0 %v1908_v5  ;;  %444 = vmatprep.subr.bf16.mxu1 %v1912_v6  ;;  %v1934_v14 = vld [vmem:[#allocation2 + $0x6c] ss:$16 sps:$4 sm:$0xff]   ;;  %v1936_v15 = vld [vmem:[#allocation2 + $0x60] ss:$16 sps:$4 sm:$0xff]   ;;  %v1940_v16 = vld [vmem:[#allocation2 + $0x68] ss:$16 sps:$4 sm:$0xff]  }
  0x2d   :  { %v1942_v17 = vld [vmem:[#allocation2 + $0x84] ss:$16 sps:$4 sm:$0xff]   ;;  %v1946_v18 = vld [vmem:[#allocation2 + $0x8c] ss:$16 sps:$4 sm:$0xff]   ;;  %v1948_v19 = vld [vmem:[#allocation2 + $0x80] ss:$16 sps:$4 sm:$0xff]  }
  0x2e   :  { %v1950_v20 = vld [vmem:[#allocation2 + $0x88] ss:$16 sps:$4 sm:$0xff]   ;;  %v1954_v21 = vld [vmem:[#allocation2 + $0xa4] ss:$16 sps:$4 sm:$0xff]   ;;  %v1958_v22 = vld [vmem:[#allocation2 + $0xac] ss:$16 sps:$4 sm:$0xff]  }
  0x2f   :  { %404 = vmatpush1.bf16.msra.mxu0 %v1914_v7  ;;  %445 = vmatpush1.bf16.msra.mxu1 %v1917_v8  ;;  %v1962_v23 = vld [vmem:[#allocation2 + $0xa0] ss:$16 sps:$4 sm:$0xff]   ;;  %v1964_v24 = vld [vmem:[#allocation2 + $0xa8] ss:$16 sps:$4 sm:$0xff]   ;;  %v1968_v25 = vld [vmem:[#allocation2 + $0xc4] ss:$16 sps:$4 sm:$0xff]  }
  0x30   :  { %405 = vmatprep.subr.bf16.mxu0 %v1920_v9  ;;  %446 = vmatprep.subr.bf16.mxu1 %v1922_v10  ;;  %v1970_v26 = vld [vmem:[#allocation2 + $0xcc] ss:$16 sps:$4 sm:$0xff]   ;;  %v54_v27 = vld [vmem:[%s2412_s0] sm:$0xff]  ;;  %v1982_v30 = vld [vmem:[#allocation2 + $0xc8] ss:$16 sps:$4 sm:$0xff]   ;;  %v105_v38 = vshrl.u32 %v104_v37, 7 }
  0x31   :  { %65 = vperm.xlu0 %1542, %v54_v27   ;;  %v1980_v29 = vld [vmem:[#allocation2 + $0xc0] ss:$16 sps:$4 sm:$0xff]   ;;  %v1986_v31 = vld [vmem:[#allocation2 + $0xe4] ss:$16 sps:$4 sm:$0xff]   ;;  %v1988_v32 = vld [vmem:[#allocation2 + $0xec] ss:$16 sps:$4 sm:$0xff]  }
  0x32   :  { %v58_v33 = vld [vmem:[%s2412_s0 + $0x20] sm:$0xff]  ;;  %v1997_v35 = vld [vmem:[#allocation2 + $0xe8] ss:$16 sps:$4 sm:$0xff]   ;;  %v60_v36 = vld [vmem:[%s2412_s0 + $0x30] sm:$0xff]  ;;  %v106_v39 = vsub.s32 0, %v105_v38  ;;  %v110_v41 = vsub.s32 1, %v105_v38 }
  0x33   :  { %406 = vmatpush1.bf16.msra.mxu0 %v1924_v11  ;;  %447 = vmatpush1.bf16.msra.mxu1 %v1926_v12  ;;  %v1995_v34 = vld [vmem:[#allocation2 + $0xe0] ss:$16 sps:$4 sm:$0xff]   ;;  %v114_v46 = vsub.s32 2, %v105_v38  ;;  %v118_v51 = vsub.s32 3, %v105_v38  ;;  %vm1832_vm0 = vmmov 0   ;;  %s1834_s18 = smov [#allocation7]  }
  0x34   :  { %407 = vmatprep.subr.bf16.mxu0 %v1930_v13  ;;  %448 = vmatprep.subr.bf16.mxu1 %v1934_v14  ;;  %v62_v40 = vld [vmem:[%s2413_s1] sm:$0xf]  ;;  %s1388_s19 = sshll.u32 %s1834_s18, 4  ;;  %s1389_s19 = int_to_ptr.vmem [resolvable:$true] %s1388_s19 }
  0x35   :  { %70 = vperm.xlu0 %1542, %v55_v28   ;;  %v2047_v42 = vrot.slane %v62_v40, %v106_v39  ;;  %v2049_v43 = vrot.slane %v62_v40, %v110_v41  ;;  %v53_v44 = vld [vmem:[%s2415_s3] sm:$0xf]  ;;  %v2060_v52 = vrot.slane %v62_v40, %v114_v46  ;;  %v2064_v55 = vrot.slane %v62_v40, %v118_v51  ;;  %s1796_s20 = scalar_lea.vmem %s1389_s19, 128  ;;  %p1801_p3 = scmp.lt.s32.totalorder %s1389_s19, %s1389_s19 }
  0x36   :  { %v2055_v48 = vrot.slane %v53_v44, %v106_v39  ;;  %v2058_v50 = vrot.slane %v53_v44, %v110_v41  ;;  %v2067_v60 = vrot.slane %v53_v44, %v114_v46  ;;  %v2070_v40 = vrot.slane %v53_v44, %v118_v51  ;;  %p1797_p2 = scmp.ne.s32.totalorder %s1389_s19, %s1796_s20  ;;  %p1802_p4 = scmp.lt.s32.totalorder %s1796_s20, %s1796_s20 }
  0x37   :  { %408 = vmatpush1.bf16.msra.mxu0 %v1936_v15  ;;  %449 = vmatpush1.bf16.msra.mxu1 %v1940_v16 }
  0x38   :  { %409 = vmatprep.subr.bf16.mxu0 %v1942_v17  ;;  %450 = vmatprep.subr.bf16.mxu1 %v1946_v18  ;;  %p1803_p5 = por %p1802_p4, %p1801_p3 }
  0x39   :  { %85 = vperm.xlu0 %1542, %v58_v33  }
  0x3a   :  { %p1804_p6 = pnand %p1803_p5, %p1797_p2 }
  0x3b   :  { %410 = vmatpush1.bf16.msra.mxu0 %v1948_v19  ;;  %451 = vmatpush1.bf16.msra.mxu1 %v1950_v20 }
  0x3c   :  { %411 = vmatprep.subr.bf16.mxu0 %v1954_v21  ;;  %452 = vmatprep.subr.bf16.mxu1 %v1958_v22 }
  0x3d   :  { %95 = vperm.xlu0 %1542, %v60_v36  }
  0x3f   :  { %412 = vmatpush1.bf16.msra.mxu0 %v1962_v23  ;;  %453 = vmatpush1.bf16.msra.mxu1 %v1964_v24 }
  0x40   :  { %413 = vmatprep.subr.bf16.mxu0 %v1968_v25  ;;  %454 = vmatprep.subr.bf16.mxu1 %v1970_v26 }
  0x43   :  { %414 = vmatpush1.bf16.msra.mxu0 %v1980_v29  ;;  %455 = vmatpush1.bf16.msra.mxu1 %v1982_v30 }
  0x44   :  { %415 = vmatprep.subr.bf16.mxu0 %v1986_v31  ;;  %456 = vmatprep.subr.bf16.mxu1 %v1988_v32 }
  0x47   :  { %416 = vmatpush1.bf16.msra.mxu0 %v1995_v34  ;;  %457 = vmatpush1.bf16.msra.mxu1 %v1997_v35 }
  0x48   :  { %512 = vmatprep.subr.bf16.mxu0 %v1898_v1  ;;  %553 = vmatprep.subr.bf16.mxu1 %v1900_v2 }
  0x4a   :  { %434 = vmatmul.mubr.bf16.vlgmr.msra.gmra.mrb[0].mxu0 %v1830_v0  ;;  %475 = vmatmul.mubr.bf16.vlgmr.msra.gmra.mrb[0].mxu1 %v1830_v0 }
  0x4b   :  { %513 = vmatpush1.bf16.msra.mxu0 %v1903_v3  ;;  %554 = vmatpush1.bf16.msra.mxu1 %v1905_v4 }
  0x4c   :  { %514 = vmatprep.subr.bf16.mxu0 %v1908_v5  ;;  %555 = vmatprep.subr.bf16.mxu1 %v1912_v6 }
  0x4d   :  { %544 = vmatprep.mubr.bf16.mxu0 %v1830_v0  ;;  %585 = vmatprep.mubr.bf16.mxu1 %v1830_v0 }
  0x4f   :  { %515 = vmatpush1.bf16.msra.mxu0 %v1914_v7  ;;  %556 = vmatpush1.bf16.msra.mxu1 %v1917_v8 }
  0x50   :  { %516 = vmatprep.subr.bf16.mxu0 %v1920_v9  ;;  %557 = vmatprep.subr.bf16.mxu1 %v1922_v10 }
  0x53   :  { %517 = vmatpush1.bf16.msra.mxu0 %v1924_v11  ;;  %558 = vmatpush1.bf16.msra.mxu1 %v1926_v12 }
  0x54   :  { %518 = vmatprep.subr.bf16.mxu0 %v1930_v13  ;;  %559 = vmatprep.subr.bf16.mxu1 %v1934_v14 }
  0x57   :  { %519 = vmatpush1.bf16.msra.mxu0 %v1936_v15  ;;  %560 = vmatpush1.bf16.msra.mxu1 %v1940_v16 }
  0x58   :  { %520 = vmatprep.subr.bf16.mxu0 %v1942_v17  ;;  %561 = vmatprep.subr.bf16.mxu1 %v1946_v18 }
  0x5b   :  { %521 = vmatpush1.bf16.msra.mxu0 %v1948_v19  ;;  %562 = vmatpush1.bf16.msra.mxu1 %v1950_v20 }
  0x5c   :  { %522 = vmatprep.subr.bf16.mxu0 %v1954_v21  ;;  %563 = vmatprep.subr.bf16.mxu1 %v1958_v22 }
  0x5f   :  { %523 = vmatpush1.bf16.msra.mxu0 %v1962_v23  ;;  %564 = vmatpush1.bf16.msra.mxu1 %v1964_v24 }
  0x60   :  { %524 = vmatprep.subr.bf16.mxu0 %v1968_v25  ;;  %565 = vmatprep.subr.bf16.mxu1 %v1970_v26 }
  0x63   :  { %525 = vmatpush1.bf16.msra.mxu0 %v1980_v29  ;;  %566 = vmatpush1.bf16.msra.mxu1 %v1982_v30 }
  0x64   :  { %526 = vmatprep.subr.bf16.mxu0 %v1986_v31  ;;  %567 = vmatprep.subr.bf16.mxu1 %v1988_v32 }
  0x67   :  { %527 = vmatpush1.bf16.msra.mxu0 %v1995_v34  ;;  %568 = vmatpush1.bf16.msra.mxu1 %v1997_v35 }
  0x68   :  { %623 = vmatprep.subr.bf16.mxu0 %v1898_v1  ;;  %664 = vmatprep.subr.bf16.mxu1 %v1900_v2 }
  0xb0   :  { %v66_v45 = vpop.permute.xlu0 %65 }
  0xb1   :  { %v124_v47 = vmul.f32 %v2047_v42, %v66_v45  ;;  %v125_v49 = vmul.f32 %v2049_v43, %v66_v45  ;;  %v126_v59 = vmul.f32 %v2060_v52, %v66_v45  ;;  %v127_v39 = vmul.f32 %v2064_v55, %v66_v45 }
  0xb3   :  { %v177_v53 = vadd.f32 %v2055_v48, %v124_v47  ;;  %v178_v54 = vadd.f32 %v2058_v50, %v125_v49  ;;  %v179_v41 = vadd.f32 %v2067_v60, %v126_v59  ;;  %v180_v46 = vadd.f32 %v2070_v40, %v127_v39  ;;  %v57_v39 = vld [vmem:[%s2412_s0 + $0x18] sm:$0xff] }
 0x11d   :  { %v435_v56 = vpop.f32.mrb[0].mxu0  ;;  %v476_v57 = vpop.f32.mrb[0].mxu1 }
 0x11e   :  { %v483_v58 = vadd.f32 %v435_v56, %v177_v53  ;;  %v437_v61 = vpop.f32.mrb[1].mxu0  ;;  %v478_v62 = vpop.f32.mrb[1].mxu1  ;;  %v485_v47 = vadd.f32 %v476_v57, %v179_v41  ;;  %v59_v41 = vld [vmem:[%s2412_s0 + $0x28] sm:$0xff] }
 0x11f   :  { %v484_v63 = vadd.f32 %v437_v61, %v178_v54  ;;  %v439_v27 = vpop.f32.mrb[2].mxu0  ;;  %v480_v28 = vpop.f32.mrb[2].mxu1  ;;  %v486_v49 = vadd.f32 %v478_v62, %v180_v46  ;;  %v61_v46 = vld [vmem:[%s2412_s0 + $0x38] sm:$0xff] }
 0x120   :  { %v1430_v33 = vmul.f32 -1.442695, %v483_v58  ;;  %v440_v36 = vpop.f32.mrb[3].mxu0  ;;  %v481_v37 = vpop.f32.mrb[3].mxu1  ;;  %v1432_v53 = vmul.f32 -1.442695, %v485_v47 }
 0x121   :  { %v1431_v38 = vmul.f32 -1.442695, %v484_v63  ;;  %v71_v47 = vpop.permute.xlu0 %70 }
 0x122   :  { %1592 = vpow2.f32 %v1430_v33 }
 0x123   :  { %1594 = vpow2.f32 %v1431_v38  ;;  %v56_v38 = vld [vmem:[%s2412_s0 + $0x10] sm:$0xff] }
 0x124   :  { %1596 = vtanh.f32 %v486_v49  ;;  %75 = vperm.xlu1 %1543, %v56_v38   ;;  %v128_v49 = vmul.f32 %v2047_v42, %v71_v47  ;;  %v131_v38 = vmul.f32 %v2064_v55, %v71_v47 }
 0x125   :  { %1598 = vpow2.f32 %v1432_v53  ;;  %v129_v53 = vmul.f32 %v2049_v43, %v71_v47 }
 0x128   :  { %80 = vperm.xlu1 %1543, %v57_v39  }
 0x12c   :  { %v1593_v54 = vpop.eup %1592  ;;  %90 = vperm.xlu1 %1543, %v59_v41  }
 0x12d   :  { %v496_v56 = vadd.f32 1.0, %v1593_v54  ;;  %v1595_v58 = vpop.eup %1594  ;;  %v181_v54 = vadd.f32 %v2055_v48, %v128_v49 }
 0x12e   :  { %v497_v61 = vadd.f32 1.0, %v1595_v58  ;;  %v1597_v45 = vpop.eup %1596 }
 0x12f   :  { %1600 = vrcp.f32 %v496_v56  ;;  %v1599_v44 = vpop.eup %1598 }
 0x130   :  { %1602 = vrcp.f32 %v497_v61  ;;  %v498_v59 = vadd.f32 1.0, %v1599_v44  ;;  %100 = vperm.xlu1 %1543, %v61_v46   ;;  %v182_v61 = vadd.f32 %v2058_v50, %v129_v53  ;;  %v184_v46 = vadd.f32 %v2070_v40, %v131_v38 }
 0x132   :  { %1604 = vrcp.f32 %v498_v59 }
 0x139   :  { %v1601_v51 = vpop.eup %1600 }
 0x13a   :  { %v507_v63 = vmul.f32 %v1601_v51, %v1597_v45  ;;  %v1603_v27 = vpop.eup %1602 }
 0x13b   :  { %v506_v28 = vmul.f32 0.0, %v1603_v27 }
 0x13c   :  { %v1605_v57 = vpop.eup %1604 }
 0x13d   :  { %v2074_v33 = vadd.f32 %v507_v63, %v506_v28 }
 0x13f   :  { %1606 = vtanh.f32 %v2074_v33 }
 0x149   :  { %v1607_v62 = vpop.eup %1606 }
 0x14a   :  { %v510_v36 = vmul.f32 %v1607_v62, %v1605_v57  ;;  %v130_v57 = vmul.f32 %v2060_v52, %v71_v47 }
 0x14c   :  { %v511_v37 = vpack.c.bf16 %v510_v36, %v510_v36  ;;  %v183_v39 = vadd.f32 %v2067_v60, %v130_v57 }
 0x14e   :  { %545 = vmatmul.mubr.bf16.vlgmr.msra.gmra.mrb[4].mxu0 %v511_v37  ;;  %586 = vmatmul.mubr.bf16.vlgmr.msra.gmra.mrb[4].mxu1 %v511_v37 }
 0x14f   :  { %624 = vmatpush1.bf16.msra.mxu0 %v1903_v3  ;;  %665 = vmatpush1.bf16.msra.mxu1 %v1905_v4 }
 0x150   :  { %625 = vmatprep.subr.bf16.mxu0 %v1908_v5  ;;  %666 = vmatprep.subr.bf16.mxu1 %v1912_v6 }
 0x151   :  { %655 = vmatprep.mubr.bf16.mxu0 %v1830_v0  ;;  %696 = vmatprep.mubr.bf16.mxu1 %v1830_v0 }
 0x153   :  { %626 = vmatpush1.bf16.msra.mxu0 %v1914_v7  ;;  %667 = vmatpush1.bf16.msra.mxu1 %v1917_v8 }
 0x154   :  { %627 = vmatprep.subr.bf16.mxu0 %v1920_v9  ;;  %668 = vmatprep.subr.bf16.mxu1 %v1922_v10 }
 0x157   :  { %628 = vmatpush1.bf16.msra.mxu0 %v1924_v11  ;;  %669 = vmatpush1.bf16.msra.mxu1 %v1926_v12 }
 0x158   :  { %629 = vmatprep.subr.bf16.mxu0 %v1930_v13  ;;  %670 = vmatprep.subr.bf16.mxu1 %v1934_v14 }
 0x15b   :  { %630 = vmatpush1.bf16.msra.mxu0 %v1936_v15  ;;  %671 = vmatpush1.bf16.msra.mxu1 %v1940_v16 }
 0x15c   :  { %631 = vmatprep.subr.bf16.mxu0 %v1942_v17  ;;  %672 = vmatprep.subr.bf16.mxu1 %v1946_v18 }
 0x15f   :  { %632 = vmatpush1.bf16.msra.mxu0 %v1948_v19  ;;  %673 = vmatpush1.bf16.msra.mxu1 %v1950_v20 }
 0x160   :  { %633 = vmatprep.subr.bf16.mxu0 %v1954_v21  ;;  %674 = vmatprep.subr.bf16.mxu1 %v1958_v22 }
 0x163   :  { %634 = vmatpush1.bf16.msra.mxu0 %v1962_v23  ;;  %675 = vmatpush1.bf16.msra.mxu1 %v1964_v24 }
 0x164   :  { %635 = vmatprep.subr.bf16.mxu0 %v1968_v25  ;;  %676 = vmatprep.subr.bf16.mxu1 %v1970_v26 }
 0x167   :  { %636 = vmatpush1.bf16.msra.mxu0 %v1980_v29  ;;  %677 = vmatpush1.bf16.msra.mxu1 %v1982_v30 }
 0x168   :  { %637 = vmatprep.subr.bf16.mxu0 %v1986_v31  ;;  %678 = vmatprep.subr.bf16.mxu1 %v1988_v32 }
 0x16b   :  { %638 = vmatpush1.bf16.msra.mxu0 %v1995_v34  ;;  %679 = vmatpush1.bf16.msra.mxu1 %v1997_v35 }
 0x16c   :  { %734 = vmatprep.subr.bf16.mxu0 %v1898_v1  ;;  %775 = vmatprep.subr.bf16.mxu1 %v1900_v2 }
 0x221   :  { %v546_v56 = vpop.f32.mrb[4].mxu0  ;;  %v587_v58 = vpop.f32.mrb[4].mxu1 }
 0x222   :  { %v594_v45 = vadd.f32 %v546_v56, %v181_v54  ;;  %v548_v44 = vpop.f32.mrb[5].mxu0  ;;  %v589_v51 = vpop.f32.mrb[5].mxu1  ;;  %v596_v41 = vadd.f32 %v587_v58, %v183_v39 }
 0x223   :  { %v595_v63 = vadd.f32 %v548_v44, %v182_v61  ;;  %v550_v27 = vpop.f32.mrb[6].mxu0  ;;  %v591_v59 = vpop.f32.mrb[6].mxu1  ;;  %v597_v49 = vadd.f32 %v589_v51, %v184_v46 }
 0x224   :  { %v1433_v28 = vmul.f32 -1.442695, %v594_v45  ;;  %v551_v62 = vpop.f32.mrb[7].mxu0  ;;  %v592_v36 = vpop.f32.mrb[7].mxu1  ;;  %v1435_v53 = vmul.f32 -1.442695, %v596_v41 }
 0x225   :  { %v1434_v37 = vmul.f32 -1.442695, %v595_v63 }
 0x226   :  { %1608 = vpow2.f32 %v1433_v28 }
 0x227   :  { %1610 = vpow2.f32 %v1434_v37 }
 0x228   :  { %1612 = vtanh.f32 %v597_v49 }
 0x229   :  { %1614 = vpow2.f32 %v1435_v53 }
 0x230   :  { %v1609_v54 = vpop.eup %1608 }
 0x231   :  { %v607_v56 = vadd.f32 1.0, %v1609_v54  ;;  %v1611_v61 = vpop.eup %1610 }
 0x232   :  { %v608_v45 = vadd.f32 1.0, %v1611_v61  ;;  %v1613_v44 = vpop.eup %1612 }
 0x233   :  { %1616 = vrcp.f32 %v607_v56  ;;  %v1615_v63 = vpop.eup %1614 }
 0x234   :  { %1618 = vrcp.f32 %v608_v45  ;;  %v609_v28 = vadd.f32 1.0, %v1615_v63 }
 0x236   :  { %1620 = vrcp.f32 %v609_v28 }
 0x23d   :  { %v1617_v27 = vpop.eup %1616 }
 0x23e   :  { %v618_v47 = vmul.f32 %v1617_v27, %v1613_v44  ;;  %v1619_v59 = vpop.eup %1618 }
 0x23f   :  { %v617_v58 = vmul.f32 %v1619_v59, %v2074_v33  ;;  %v76_v33 = vpop.permute.xlu1 %75 }
 0x240   :  { %v1621_v51 = vpop.eup %1620  ;;  %v132_v38 = vmul.f32 %v2047_v42, %v76_v33  ;;  %v133_v39 = vmul.f32 %v2049_v43, %v76_v33  ;;  %v134_v56 = vmul.f32 %v2060_v52, %v76_v33 }
 0x241   :  { %v2132_v57 = vadd.f32 %v618_v47, %v617_v58 }
 0x242   :  { %v185_v41 = vadd.f32 %v2055_v48, %v132_v38  ;;  %v186_v46 = vadd.f32 %v2058_v50, %v133_v39 }
 0x243   :  { %1622 = vtanh.f32 %v2132_v57 }
 0x24d   :  { %v1623_v62 = vpop.eup %1622 }
 0x24e   :  { %v621_v36 = vmul.f32 %v1623_v62, %v1621_v51  ;;  %v135_v51 = vmul.f32 %v2064_v55, %v76_v33  ;;  %v187_v62 = vadd.f32 %v2067_v60, %v134_v56 }
 0x250   :  { %v622_v37 = vpack.c.bf16 %v621_v36, %v621_v36  ;;  %v188_v36 = vadd.f32 %v2070_v40, %v135_v51 }
 0x252   :  { %656 = vmatmul.mubr.bf16.vlgmr.msra.gmra.mrb[8].mxu0 %v622_v37  ;;  %697 = vmatmul.mubr.bf16.vlgmr.msra.gmra.mrb[8].mxu1 %v622_v37 }
 0x253   :  { %735 = vmatpush1.bf16.msra.mxu0 %v1903_v3  ;;  %776 = vmatpush1.bf16.msra.mxu1 %v1905_v4 }
 0x254   :  { %736 = vmatprep.subr.bf16.mxu0 %v1908_v5  ;;  %777 = vmatprep.subr.bf16.mxu1 %v1912_v6 }
 0x255   :  { %766 = vmatprep.mubr.bf16.mxu0 %v1830_v0  ;;  %807 = vmatprep.mubr.bf16.mxu1 %v1830_v0 }
 0x257   :  { %737 = vmatpush1.bf16.msra.mxu0 %v1914_v7  ;;  %778 = vmatpush1.bf16.msra.mxu1 %v1917_v8 }
 0x258   :  { %738 = vmatprep.subr.bf16.mxu0 %v1920_v9  ;;  %779 = vmatprep.subr.bf16.mxu1 %v1922_v10 }
 0x25b   :  { %739 = vmatpush1.bf16.msra.mxu0 %v1924_v11  ;;  %780 = vmatpush1.bf16.msra.mxu1 %v1926_v12 }
 0x25c   :  { %740 = vmatprep.subr.bf16.mxu0 %v1930_v13  ;;  %781 = vmatprep.subr.bf16.mxu1 %v1934_v14 }
 0x25f   :  { %741 = vmatpush1.bf16.msra.mxu0 %v1936_v15  ;;  %782 = vmatpush1.bf16.msra.mxu1 %v1940_v16 }
 0x260   :  { %742 = vmatprep.subr.bf16.mxu0 %v1942_v17  ;;  %783 = vmatprep.subr.bf16.mxu1 %v1946_v18 }
 0x263   :  { %743 = vmatpush1.bf16.msra.mxu0 %v1948_v19  ;;  %784 = vmatpush1.bf16.msra.mxu1 %v1950_v20 }
 0x264   :  { %744 = vmatprep.subr.bf16.mxu0 %v1954_v21  ;;  %785 = vmatprep.subr.bf16.mxu1 %v1958_v22 }
 0x267   :  { %745 = vmatpush1.bf16.msra.mxu0 %v1962_v23  ;;  %786 = vmatpush1.bf16.msra.mxu1 %v1964_v24 }
 0x268   :  { %746 = vmatprep.subr.bf16.mxu0 %v1968_v25  ;;  %787 = vmatprep.subr.bf16.mxu1 %v1970_v26 }
 0x26b   :  { %747 = vmatpush1.bf16.msra.mxu0 %v1980_v29  ;;  %788 = vmatpush1.bf16.msra.mxu1 %v1982_v30 }
 0x26c   :  { %748 = vmatprep.subr.bf16.mxu0 %v1986_v31  ;;  %789 = vmatprep.subr.bf16.mxu1 %v1988_v32 }
 0x26f   :  { %749 = vmatpush1.bf16.msra.mxu0 %v1995_v34  ;;  %790 = vmatpush1.bf16.msra.mxu1 %v1997_v35 }
 0x270   :  { %845 = vmatprep.subr.bf16.mxu0 %v1898_v1  ;;  %886 = vmatprep.subr.bf16.mxu1 %v1900_v2 }
 0x325   :  { %v657_v49 = vpop.f32.mrb[8].mxu0  ;;  %v698_v53 = vpop.f32.mrb[8].mxu1 }
 0x326   :  { %v705_v54 = vadd.f32 %v657_v49, %v185_v41  ;;  %v659_v61 = vpop.f32.mrb[9].mxu0  ;;  %v700_v45 = vpop.f32.mrb[9].mxu1  ;;  %v707_v37 = vadd.f32 %v698_v53, %v187_v62 }
 0x327   :  { %v706_v44 = vadd.f32 %v659_v61, %v186_v46  ;;  %v661_v63 = vpop.f32.mrb[10].mxu0  ;;  %v702_v27 = vpop.f32.mrb[10].mxu1  ;;  %v708_v38 = vadd.f32 %v700_v45, %v188_v36 }
 0x328   :  { %v1436_v47 = vmul.f32 -1.442695, %v705_v54  ;;  %v662_v59 = vpop.f32.mrb[11].mxu0  ;;  %v703_v28 = vpop.f32.mrb[11].mxu1  ;;  %v1438_v39 = vmul.f32 -1.442695, %v707_v37 }
 0x329   :  { %v1437_v58 = vmul.f32 -1.442695, %v706_v44 }
 0x32a   :  { %1624 = vpow2.f32 %v1436_v47 }
 0x32b   :  { %1626 = vpow2.f32 %v1437_v58 }
 0x32c   :  { %1628 = vtanh.f32 %v708_v38 }
 0x32d   :  { %1630 = vpow2.f32 %v1438_v39 }
 0x334   :  { %v1625_v41 = vpop.eup %1624 }
 0x335   :  { %v718_v49 = vadd.f32 1.0, %v1625_v41  ;;  %v1627_v46 = vpop.eup %1626 }
 0x336   :  { %v719_v54 = vadd.f32 1.0, %v1627_v46  ;;  %v1629_v61 = vpop.eup %1628 }
 0x337   :  { %1632 = vrcp.f32 %v718_v49  ;;  %v1631_v44 = vpop.eup %1630 }
 0x338   :  { %1634 = vrcp.f32 %v719_v54  ;;  %v720_v56 = vadd.f32 1.0, %v1631_v44 }
 0x33a   :  { %1636 = vrcp.f32 %v720_v56 }
 0x341   :  { %v1633_v33 = vpop.eup %1632 }
 0x342   :  { %v729_v63 = vmul.f32 %v1633_v33, %v1629_v61  ;;  %v1635_v27 = vpop.eup %1634 }
 0x343   :  { %v728_v47 = vmul.f32 %v1635_v27, %v2132_v57  ;;  %v81_v57 = vpop.permute.xlu1 %80 }
 0x344   :  { %v1637_v53 = vpop.eup %1636  ;;  %v136_v51 = vmul.f32 %v2047_v42, %v81_v57  ;;  %v137_v62 = vmul.f32 %v2049_v43, %v81_v57 }
 0x345   :  { %v2178_v59 = vadd.f32 %v729_v63, %v728_v47  ;;  %v138_v63 = vmul.f32 %v2060_v52, %v81_v57 }
 0x346   :  { %v189_v36 = vadd.f32 %v2055_v48, %v136_v51  ;;  %v190_v39 = vadd.f32 %v2058_v50, %v137_v62 }
 0x347   :  { %1638 = vtanh.f32 %v2178_v59 }
 0x351   :  { %v1639_v45 = vpop.eup %1638 }
 0x352   :  { %v732_v28 = vmul.f32 %v1639_v45, %v1637_v53  ;;  %v139_v53 = vmul.f32 %v2064_v55, %v81_v57  ;;  %v191_v45 = vadd.f32 %v2067_v60, %v138_v63 }
 0x354   :  { %v733_v58 = vpack.c.bf16 %v732_v28, %v732_v28 }
 0x356   :  { %767 = vmatmul.mubr.bf16.vlgmr.msra.gmra.mrb[12].mxu0 %v733_v58  ;;  %808 = vmatmul.mubr.bf16.vlgmr.msra.gmra.mrb[12].mxu1 %v733_v58  ;;  %v192_v58 = vadd.f32 %v2070_v40, %v139_v53 }
 0x357   :  { %846 = vmatpush1.bf16.msra.mxu0 %v1903_v3  ;;  %887 = vmatpush1.bf16.msra.mxu1 %v1905_v4 }
 0x358   :  { %847 = vmatprep.subr.bf16.mxu0 %v1908_v5  ;;  %888 = vmatprep.subr.bf16.mxu1 %v1912_v6 }
 0x359   :  { %877 = vmatprep.mubr.bf16.mxu0 %v1830_v0  ;;  %918 = vmatprep.mubr.bf16.mxu1 %v1830_v0 }
 0x35b   :  { %848 = vmatpush1.bf16.msra.mxu0 %v1914_v7  ;;  %889 = vmatpush1.bf16.msra.mxu1 %v1917_v8 }
 0x35c   :  { %849 = vmatprep.subr.bf16.mxu0 %v1920_v9  ;;  %890 = vmatprep.subr.bf16.mxu1 %v1922_v10 }
 0x35f   :  { %850 = vmatpush1.bf16.msra.mxu0 %v1924_v11  ;;  %891 = vmatpush1.bf16.msra.mxu1 %v1926_v12 }
 0x360   :  { %851 = vmatprep.subr.bf16.mxu0 %v1930_v13  ;;  %892 = vmatprep.subr.bf16.mxu1 %v1934_v14 }
 0x363   :  { %852 = vmatpush1.bf16.msra.mxu0 %v1936_v15  ;;  %893 = vmatpush1.bf16.msra.mxu1 %v1940_v16 }
 0x364   :  { %853 = vmatprep.subr.bf16.mxu0 %v1942_v17  ;;  %894 = vmatprep.subr.bf16.mxu1 %v1946_v18 }
 0x367   :  { %854 = vmatpush1.bf16.msra.mxu0 %v1948_v19  ;;  %895 = vmatpush1.bf16.msra.mxu1 %v1950_v20 }
 0x368   :  { %855 = vmatprep.subr.bf16.mxu0 %v1954_v21  ;;  %896 = vmatprep.subr.bf16.mxu1 %v1958_v22 }
 0x36b   :  { %856 = vmatpush1.bf16.msra.mxu0 %v1962_v23  ;;  %897 = vmatpush1.bf16.msra.mxu1 %v1964_v24 }
 0x36c   :  { %857 = vmatprep.subr.bf16.mxu0 %v1968_v25  ;;  %898 = vmatprep.subr.bf16.mxu1 %v1970_v26 }
 0x36f   :  { %858 = vmatpush1.bf16.msra.mxu0 %v1980_v29  ;;  %899 = vmatpush1.bf16.msra.mxu1 %v1982_v30 }
 0x370   :  { %859 = vmatprep.subr.bf16.mxu0 %v1986_v31  ;;  %900 = vmatprep.subr.bf16.mxu1 %v1988_v32 }
 0x373   :  { %860 = vmatpush1.bf16.msra.mxu0 %v1995_v34  ;;  %901 = vmatpush1.bf16.msra.mxu1 %v1997_v35 }
 0x374   :  { %956 = vmatprep.subr.bf16.mxu0 %v1898_v1  ;;  %997 = vmatprep.subr.bf16.mxu1 %v1900_v2 }
 0x429   :  { %v768_v37 = vpop.f32.mrb[12].mxu0  ;;  %v809_v38 = vpop.f32.mrb[12].mxu1 }
 0x42a   :  { %v816_v41 = vadd.f32 %v768_v37, %v189_v36  ;;  %v770_v49 = vpop.f32.mrb[13].mxu0  ;;  %v811_v46 = vpop.f32.mrb[13].mxu1  ;;  %v818_v28 = vadd.f32 %v809_v38, %v191_v45 }
 0x42b   :  { %v817_v54 = vadd.f32 %v770_v49, %v190_v39  ;;  %v772_v61 = vpop.f32.mrb[14].mxu0  ;;  %v813_v44 = vpop.f32.mrb[14].mxu1  ;;  %v819_v51 = vadd.f32 %v811_v46, %v192_v58 }
 0x42c   :  { %v1439_v33 = vmul.f32 -1.442695, %v816_v41  ;;  %v773_v27 = vpop.f32.mrb[15].mxu0  ;;  %v814_v56 = vpop.f32.mrb[15].mxu1  ;;  %v1441_v62 = vmul.f32 -1.442695, %v818_v28 }
 0x42d   :  { %v1440_v47 = vmul.f32 -1.442695, %v817_v54 }
 0x42e   :  { %1640 = vpow2.f32 %v1439_v33 }
 0x42f   :  { %1642 = vpow2.f32 %v1440_v47 }
 0x430   :  { %1644 = vtanh.f32 %v819_v51 }
 0x431   :  { %1646 = vpow2.f32 %v1441_v62 }
 0x438   :  { %v1641_v36 = vpop.eup %1640 }
 0x439   :  { %v829_v37 = vadd.f32 1.0, %v1641_v36  ;;  %v1643_v39 = vpop.eup %1642 }
 0x43a   :  { %v830_v41 = vadd.f32 1.0, %v1643_v39  ;;  %v1645_v49 = vpop.eup %1644 }
 0x43b   :  { %1648 = vrcp.f32 %v829_v37  ;;  %v1647_v54 = vpop.eup %1646 }
 0x43c   :  { %1650 = vrcp.f32 %v830_v41  ;;  %v831_v33 = vadd.f32 1.0, %v1647_v54 }
 0x43e   :  { %1652 = vrcp.f32 %v831_v33 }
 0x445   :  { %v1649_v61 = vpop.eup %1648 }
 0x446   :  { %v840_v57 = vmul.f32 %v1649_v61, %v1645_v49  ;;  %v1651_v44 = vpop.eup %1650 }
 0x447   :  { %v839_v38 = vmul.f32 %v1651_v44, %v2178_v59 }
 0x448   :  { %v1653_v46 = vpop.eup %1652 }
 0x449   :  { %v2224_v63 = vadd.f32 %v840_v57, %v839_v38 }
 0x44b   :  { %1654 = vtanh.f32 %v2224_v63 }
 0x455   :  { %v1655_v27 = vpop.eup %1654 }
 0x456   :  { %v843_v56 = vmul.f32 %v1655_v27, %v1653_v46  ;;  %v2273_v27 = vld [vmem:[#allocation2] ss:$16 sps:$4 sm:$0xff]  }
 0x458   :  { %v844_v47 = vpack.c.bf16 %v843_v56, %v843_v56  ;;  %v2276_v56 = vld [vmem:[#allocation2 + $0x8] ss:$16 sps:$4 sm:$0xff]  }
 0x45a   :  { %878 = vmatmul.mubr.bf16.vlgmr.msra.gmra.mrb[16].mxu0 %v844_v47  ;;  %919 = vmatmul.mubr.bf16.vlgmr.msra.gmra.mrb[16].mxu1 %v844_v47  ;;  %v2282_v47 = vld [vmem:[#allocation2 + $0x2c] ss:$16 sps:$4 sm:$0xff]  }
 0x45b   :  { %957 = vmatpush1.bf16.msra.mxu0 %v1903_v3  ;;  %998 = vmatpush1.bf16.msra.mxu1 %v1905_v4  ;;  %v86_v3 = vpop.permute.xlu0 %85 }
 0x45c   :  { %958 = vmatprep.subr.bf16.mxu0 %v1908_v5  ;;  %999 = vmatprep.subr.bf16.mxu1 %v1912_v6  ;;  %v140_v4 = vmul.f32 %v2047_v42, %v86_v3  ;;  %v141_v5 = vmul.f32 %v2049_v43, %v86_v3 }
 0x45d   :  { %988 = vmatprep.mubr.bf16.mxu0 %v1830_v0  ;;  %1029 = vmatprep.mubr.bf16.mxu1 %v1830_v0 }
 0x45e   :  { %v193_v6 = vadd.f32 %v2055_v48, %v140_v4  ;;  %v2290_v4 = vld [vmem:[#allocation2 + $0x28] ss:$16 sps:$4 sm:$0xff]  }
 0x45f   :  { %959 = vmatpush1.bf16.msra.mxu0 %v1914_v7  ;;  %1000 = vmatpush1.bf16.msra.mxu1 %v1917_v8 }
 0x460   :  { %960 = vmatprep.subr.bf16.mxu0 %v1920_v9  ;;  %1001 = vmatprep.subr.bf16.mxu1 %v1922_v10  ;;  %v194_v9 = vadd.f32 %v2058_v50, %v141_v5  ;;  %v2293_v5 = vld [vmem:[#allocation2 + $0x44] ss:$16 sps:$4 sm:$0xff]  }
 0x463   :  { %961 = vmatpush1.bf16.msra.mxu0 %v1924_v11  ;;  %1002 = vmatpush1.bf16.msra.mxu1 %v1926_v12 }
 0x464   :  { %962 = vmatprep.subr.bf16.mxu0 %v1930_v13  ;;  %1003 = vmatprep.subr.bf16.mxu1 %v1934_v14 }
 0x467   :  { %963 = vmatpush1.bf16.msra.mxu0 %v1936_v15  ;;  %1004 = vmatpush1.bf16.msra.mxu1 %v1940_v16 }
 0x468   :  { %964 = vmatprep.subr.bf16.mxu0 %v1942_v17  ;;  %1005 = vmatprep.subr.bf16.mxu1 %v1946_v18 }
 0x46b   :  { %965 = vmatpush1.bf16.msra.mxu0 %v1948_v19  ;;  %1006 = vmatpush1.bf16.msra.mxu1 %v1950_v20  ;;  %v143_v19 = vmul.f32 %v2064_v55, %v86_v3 }
 0x46c   :  { %966 = vmatprep.subr.bf16.mxu0 %v1954_v21  ;;  %1007 = vmatprep.subr.bf16.mxu1 %v1958_v22 }
 0x46d   :  { %v196_v59 = vadd.f32 %v2070_v40, %v143_v19 }
 0x46f   :  { %967 = vmatpush1.bf16.msra.mxu0 %v1962_v23  ;;  %1008 = vmatpush1.bf16.msra.mxu1 %v1964_v24 }
 0x470   :  { %968 = vmatprep.subr.bf16.mxu0 %v1968_v25  ;;  %1009 = vmatprep.subr.bf16.mxu1 %v1970_v26 }
 0x473   :  { %969 = vmatpush1.bf16.msra.mxu0 %v1980_v29  ;;  %1010 = vmatpush1.bf16.msra.mxu1 %v1982_v30 }
 0x474   :  { %970 = vmatprep.subr.bf16.mxu0 %v1986_v31  ;;  %1011 = vmatprep.subr.bf16.mxu1 %v1988_v32 }
 0x477   :  { %971 = vmatpush1.bf16.msra.mxu0 %v1995_v34  ;;  %1012 = vmatpush1.bf16.msra.mxu1 %v1997_v35 }
 0x478   :  { %1067 = vmatprep.subr.bf16.mxu0 %v1898_v1  ;;  %1108 = vmatprep.subr.bf16.mxu1 %v1900_v2  ;;  %v142_v2 = vmul.f32 %v2060_v52, %v86_v3  ;;  %v2287_v3 = vld [vmem:[#allocation2 + $0x20] ss:$16 sps:$4 sm:$0xff]  }
 0x47a   :  { %v195_v20 = vadd.f32 %v2067_v60, %v142_v2  ;;  %v2329_v2 = vld [vmem:[#allocation2 + $0xa4] ss:$16 sps:$4 sm:$0xff]  }
 0x52d   :  { %v879_v7 = vpop.f32.mrb[16].mxu0  ;;  %v920_v8 = vpop.f32.mrb[16].mxu1 }
 0x52e   :  { %v927_v10 = vadd.f32 %v879_v7, %v193_v6  ;;  %v881_v11 = vpop.f32.mrb[17].mxu0  ;;  %v922_v12 = vpop.f32.mrb[17].mxu1  ;;  %v929_v21 = vadd.f32 %v920_v8, %v195_v20  ;;  %v2296_v6 = vld [vmem:[#allocation2 + $0x4c] ss:$16 sps:$4 sm:$0xff]   ;;  %v2299_v7 = vld [vmem:[#allocation2 + $0x40] ss:$16 sps:$4 sm:$0xff]  }
 0x52f   :  { %v928_v13 = vadd.f32 %v881_v11, %v194_v9  ;;  %v883_v14 = vpop.f32.mrb[18].mxu0  ;;  %v924_v15 = vpop.f32.mrb[18].mxu1  ;;  %v930_v53 = vadd.f32 %v922_v12, %v196_v59  ;;  %v2302_v8 = vld [vmem:[#allocation2 + $0x48] ss:$16 sps:$4 sm:$0xff]   ;;  %v2305_v9 = vld [vmem:[#allocation2 + $0x64] ss:$16 sps:$4 sm:$0xff]  }
 0x530   :  { %v1442_v1 = vmul.f32 -1.442695, %v927_v10  ;;  %v884_v16 = vpop.f32.mrb[19].mxu0  ;;  %v925_v17 = vpop.f32.mrb[19].mxu1  ;;  %v1444_v45 = vmul.f32 -1.442695, %v929_v21 }
 0x531   :  { %v1443_v18 = vmul.f32 -1.442695, %v928_v13  ;;  %v2308_v10 = vld [vmem:[#allocation2 + $0x6c] ss:$16 sps:$4 sm:$0xff]   ;;  %v2311_v11 = vld [vmem:[#allocation2 + $0x60] ss:$16 sps:$4 sm:$0xff]  }
 0x532   :  { %1656 = vpow2.f32 %v1442_v1  ;;  %v2314_v12 = vld [vmem:[#allocation2 + $0x68] ss:$16 sps:$4 sm:$0xff]   ;;  %v2317_v13 = vld [vmem:[#allocation2 + $0x84] ss:$16 sps:$4 sm:$0xff]   ;;  %v2320_v14 = vld [vmem:[#allocation2 + $0x8c] ss:$16 sps:$4 sm:$0xff]  }
 0x533   :  { %1658 = vpow2.f32 %v1443_v18  ;;  %v2323_v15 = vld [vmem:[#allocation2 + $0x80] ss:$16 sps:$4 sm:$0xff]   ;;  %v2326_v1 = vld [vmem:[#allocation2 + $0x88] ss:$16 sps:$4 sm:$0xff]  }
 0x534   :  { %1660 = vtanh.f32 %v930_v53 }
 0x535   :  { %1662 = vpow2.f32 %v1444_v45 }
 0x53c   :  { %v1657_v28 = vpop.eup %1656 }
 0x53d   :  { %v940_v58 = vadd.f32 1.0, %v1657_v28  ;;  %v1659_v51 = vpop.eup %1658 }
 0x53e   :  { %v941_v62 = vadd.f32 1.0, %v1659_v51  ;;  %v1661_v36 = vpop.eup %1660 }
 0x53f   :  { %1664 = vrcp.f32 %v940_v58  ;;  %v1663_v37 = vpop.eup %1662 }
 0x540   :  { %1666 = vrcp.f32 %v941_v62  ;;  %v942_v54 = vadd.f32 1.0, %v1663_v37 }
 0x542   :  { %1668 = vrcp.f32 %v942_v54 }
 0x549   :  { %v1665_v39 = vpop.eup %1664 }
 0x54a   :  { %v951_v41 = vmul.f32 %v1665_v39, %v1661_v36  ;;  %v1667_v49 = vpop.eup %1666 }
 0x54b   :  { %v950_v61 = vmul.f32 %v1667_v49, %v2224_v63  ;;  %v2279_v63 = vld [vmem:[#allocation2 + $0x24] ss:$16 sps:$4 sm:$0xff]  }
 0x54c   :  { %v1669_v44 = vpop.eup %1668 }
 0x54d   :  { %v2270_v57 = vadd.f32 %v951_v41, %v950_v61 }
 0x54f   :  { %1670 = vtanh.f32 %v2270_v57 }
 0x559   :  { %v1671_v33 = vpop.eup %1670 }
 0x55a   :  { %v954_v38 = vmul.f32 %v1671_v33, %v1669_v44 }
 0x55c   :  { %v955_v46 = vpack.c.bf16 %v954_v38, %v954_v38 }
 0x55e   :  { %989 = vmatmul.mubr.bf16.vlgmr.msra.gmra.mrb[20].mxu0 %v955_v46  ;;  %1030 = vmatmul.mubr.bf16.vlgmr.msra.gmra.mrb[20].mxu1 %v955_v46 }
 0x55f   :  { %1068 = vmatpush1.bf16.msra.mxu0 %v2273_v27  ;;  %1109 = vmatpush1.bf16.msra.mxu1 %v2276_v56 }
 0x560   :  { %1069 = vmatprep.subr.bf16.mxu0 %v2279_v63  ;;  %1110 = vmatprep.subr.bf16.mxu1 %v2282_v47 }
 0x561   :  { %1099 = vmatprep.mubr.bf16.mxu0 %v1830_v0  ;;  %1140 = vmatprep.mubr.bf16.mxu1 %v1830_v0 }
 0x563   :  { %1070 = vmatpush1.bf16.msra.mxu0 %v2287_v3  ;;  %1111 = vmatpush1.bf16.msra.mxu1 %v2290_v4 }
 0x564   :  { %1071 = vmatprep.subr.bf16.mxu0 %v2293_v5  ;;  %1112 = vmatprep.subr.bf16.mxu1 %v2296_v6 }
 0x567   :  { %1072 = vmatpush1.bf16.msra.mxu0 %v2299_v7  ;;  %1113 = vmatpush1.bf16.msra.mxu1 %v2302_v8 }
 0x568   :  { %1073 = vmatprep.subr.bf16.mxu0 %v2305_v9  ;;  %1114 = vmatprep.subr.bf16.mxu1 %v2308_v10 }
 0x56b   :  { %1074 = vmatpush1.bf16.msra.mxu0 %v2311_v11  ;;  %1115 = vmatpush1.bf16.msra.mxu1 %v2314_v12 }
 0x56c   :  { %1075 = vmatprep.subr.bf16.mxu0 %v2317_v13  ;;  %1116 = vmatprep.subr.bf16.mxu1 %v2320_v14 }
 0x56f   :  { %1076 = vmatpush1.bf16.msra.mxu0 %v2323_v15  ;;  %1117 = vmatpush1.bf16.msra.mxu1 %v2326_v1 }
 0x570   :  { %1077 = vmatprep.subr.bf16.mxu0 %v2329_v2  ;;  %1118 = vmatprep.subr.bf16.mxu1 %v1958_v22  ;;  %v1739_v22 = vld [vmem:[#allocation2 + $0x4] ss:$16 sps:$4 sm:$0xff]  }
 0x573   :  { %1078 = vmatpush1.bf16.msra.mxu0 %v1962_v23  ;;  %1119 = vmatpush1.bf16.msra.mxu1 %v1964_v24  ;;  %v1740_v23 = vld [vmem:[#allocation2 + $0xc] ss:$16 sps:$4 sm:$0xff]   ;;  %v91_v24 = vpop.permute.xlu1 %90 }
 0x574   :  { %1079 = vmatprep.subr.bf16.mxu0 %v1968_v25  ;;  %1120 = vmatprep.subr.bf16.mxu1 %v1970_v26  ;;  %v144_v25 = vmul.f32 %v2047_v42, %v91_v24  ;;  %v145_v26 = vmul.f32 %v2049_v43, %v91_v24  ;;  %v146_v21 = vmul.f32 %v2060_v52, %v91_v24 }
 0x575   :  { %v147_v28 = vmul.f32 %v2064_v55, %v91_v24 }
 0x576   :  { %v199_v58 = vadd.f32 %v2067_v60, %v146_v21 }
 0x577   :  { %1080 = vmatpush1.bf16.msra.mxu0 %v1980_v29  ;;  %1121 = vmatpush1.bf16.msra.mxu1 %v1982_v30  ;;  %v197_v29 = vadd.f32 %v2055_v48, %v144_v25  ;;  %v200_v62 = vadd.f32 %v2070_v40, %v147_v28 }
 0x578   :  { %1081 = vmatprep.subr.bf16.mxu0 %v1986_v31  ;;  %1122 = vmatprep.subr.bf16.mxu1 %v1988_v32  ;;  %v198_v31 = vadd.f32 %v2058_v50, %v145_v26 }
 0x57b   :  { %1082 = vmatpush1.bf16.msra.mxu0 %v1995_v34  ;;  %1123 = vmatpush1.bf16.msra.mxu1 %v1997_v35 }
 0x57c   :  { %1178 = vmatprep.subr.bf16.mxu0 %v1739_v22  ;;  %1219 = vmatprep.subr.bf16.mxu1 %v1740_v23 }
 0x631   :  { %v990_v30 = vpop.f32.mrb[20].mxu0  ;;  %v1031_v16 = vpop.f32.mrb[20].mxu1 }
 0x632   :  { %v1038_v32 = vadd.f32 %v990_v30, %v197_v29  ;;  %v992_v17 = vpop.f32.mrb[21].mxu0  ;;  %v1033_v34 = vpop.f32.mrb[21].mxu1  ;;  %v1040_v51 = vadd.f32 %v1031_v16, %v199_v58 }
 0x633   :  { %v1039_v18 = vadd.f32 %v992_v17, %v198_v31  ;;  %v994_v35 = vpop.f32.mrb[22].mxu0  ;;  %v1035_v19 = vpop.f32.mrb[22].mxu1  ;;  %v1041_v36 = vadd.f32 %v1033_v34, %v200_v62 }
 0x634   :  { %v1445_v20 = vmul.f32 -1.442695, %v1038_v32  ;;  %v995_v59 = vpop.f32.mrb[23].mxu0  ;;  %v1036_v53 = vpop.f32.mrb[23].mxu1  ;;  %v1447_v37 = vmul.f32 -1.442695, %v1040_v51 }
 0x635   :  { %v1446_v45 = vmul.f32 -1.442695, %v1039_v18 }
 0x636   :  { %1672 = vpow2.f32 %v1445_v20 }
 0x637   :  { %1674 = vpow2.f32 %v1446_v45 }
 0x638   :  { %1676 = vtanh.f32 %v1041_v36 }
 0x639   :  { %1678 = vpow2.f32 %v1447_v37 }
 0x640   :  { %v1673_v39 = vpop.eup %1672 }
 0x641   :  { %v1051_v41 = vadd.f32 1.0, %v1673_v39  ;;  %v1675_v49 = vpop.eup %1674 }
 0x642   :  { %v1052_v54 = vadd.f32 1.0, %v1675_v49  ;;  %v1677_v61 = vpop.eup %1676 }
 0x643   :  { %1680 = vrcp.f32 %v1051_v41  ;;  %v1679_v44 = vpop.eup %1678 }
 0x644   :  { %1682 = vrcp.f32 %v1052_v54  ;;  %v1053_v22 = vadd.f32 1.0, %v1679_v44 }
 0x646   :  { %1684 = vrcp.f32 %v1053_v22 }
 0x64d   :  { %v1681_v33 = vpop.eup %1680 }
 0x64e   :  { %v1062_v38 = vmul.f32 %v1681_v33, %v1677_v61  ;;  %v1683_v46 = vpop.eup %1682 }
 0x64f   :  { %v1061_v23 = vmul.f32 %v1683_v46, %v2270_v57  ;;  %v1742_v57 = vld [vmem:[#allocation2 + $0xa0] ss:$16 sps:$4 sm:$0xff]  }
 0x650   :  { %v1685_v25 = vpop.eup %1684 }
 0x651   :  { %v2352_v24 = vadd.f32 %v1062_v38, %v1061_v23 }
 0x653   :  { %1686 = vtanh.f32 %v2352_v24 }
 0x65d   :  { %v1687_v26 = vpop.eup %1686 }
 0x65e   :  { %v1065_v29 = vmul.f32 %v1687_v26, %v1685_v25  ;;  %v1288_v25 = vld [vmem:[#allocation5] sm:$0xff]  ;;  %v1289_v26 = vld [vmem:[#allocation5 + $0x8] sm:$0xff] }
 0x660   :  { %v1066_v30 = vpack.c.bf16 %v1065_v29, %v1065_v29  ;;  %v1508_v29 = vpack.c.bf16 %v1289_v26, %v1288_v25 }
 0x662   :  { %1100 = vmatmul.mubr.bf16.vlgmr.msra.gmra.mrb[24].mxu0 %v1066_v30  ;;  %1141 = vmatmul.mubr.bf16.vlgmr.msra.gmra.mrb[24].mxu1 %v1066_v30  ;;  %v1831_v30 = vmov 0.0|0.0  }
 0x663   :  { %1179 = vmatpush1.bf16.msra.mxu0 %v2273_v27  ;;  %1220 = vmatpush1.bf16.msra.mxu1 %v2276_v56  ;;  %v1743_v27 = vld [vmem:[#allocation2 + $0xa8] ss:$16 sps:$4 sm:$0xff]   ;;  %v1744_v56 = vld [vmem:[#allocation2 + $0xc4] ss:$16 sps:$4 sm:$0xff]  }
 0x664   :  { %1180 = vmatprep.subr.bf16.mxu0 %v2279_v63  ;;  %1221 = vmatprep.subr.bf16.mxu1 %v2282_v47  ;;  %v1745_v63 = vld [vmem:[#allocation2 + $0xcc] ss:$16 sps:$4 sm:$0xff]   ;;  %v1746_v47 = vld [vmem:[#allocation2 + $0xc0] ss:$16 sps:$4 sm:$0xff]  }
 0x665   :  { %1210 = vmatprep.mubr.bf16.mxu0 %v1830_v0  ;;  %1251 = vmatprep.mubr.bf16.mxu1 %v1830_v0  ;;  %v1741_v0 = vld [vmem:[#allocation2 + $0xac] ss:$16 sps:$4 sm:$0xff]  }
 0x667   :  { %1181 = vmatpush1.bf16.msra.mxu0 %v2287_v3  ;;  %1222 = vmatpush1.bf16.msra.mxu1 %v2290_v4  ;;  %v1747_v3 = vld [vmem:[#allocation2 + $0xc8] ss:$16 sps:$4 sm:$0xff]   ;;  %v1748_v4 = vld [vmem:[#allocation2 + $0xe4] ss:$16 sps:$4 sm:$0xff]  }
 0x668   :  { %1182 = vmatprep.subr.bf16.mxu0 %v2293_v5  ;;  %1223 = vmatprep.subr.bf16.mxu1 %v2296_v6  ;;  %v1749_v5 = vld [vmem:[#allocation2 + $0xec] ss:$16 sps:$4 sm:$0xff]   ;;  %v1750_v6 = vld [vmem:[#allocation2 + $0xe0] ss:$16 sps:$4 sm:$0xff]  }
 0x66b   :  { %1183 = vmatpush1.bf16.msra.mxu0 %v2299_v7  ;;  %1224 = vmatpush1.bf16.msra.mxu1 %v2302_v8  ;;  %v1751_v7 = vld [vmem:[#allocation2 + $0xe8] ss:$16 sps:$4 sm:$0xff]   ;;  %v96_v8 = vpop.permute.xlu0 %95 }
 0x66c   :  { %1184 = vmatprep.subr.bf16.mxu0 %v2305_v9  ;;  %1225 = vmatprep.subr.bf16.mxu1 %v2308_v10  ;;  %v148_v9 = vmul.f32 %v2047_v42, %v96_v8  ;;  %v149_v10 = vmul.f32 %v2049_v43, %v96_v8  ;;  %v150_v17 = vmul.f32 %v2060_v52, %v96_v8 }
 0x66d   :  { %v151_v20 = vmul.f32 %v2064_v55, %v96_v8  ;;  %v1298_v8 = vld [vmem:[#allocation5 + $0x50] sm:$0xff] }
 0x66e   :  { %v203_v21 = vadd.f32 %v2067_v60, %v150_v17 }
 0x66f   :  { %1185 = vmatpush1.bf16.msra.mxu0 %v2311_v11  ;;  %1226 = vmatpush1.bf16.msra.mxu1 %v2314_v12  ;;  %v201_v11 = vadd.f32 %v2055_v48, %v148_v9  ;;  %v204_v53 = vadd.f32 %v2070_v40, %v151_v20  ;;  %v1299_v9 = vld [vmem:[#allocation5 + $0x58] sm:$0xff] }
 0x670   :  { %1186 = vmatprep.subr.bf16.mxu0 %v2317_v13  ;;  %1227 = vmatprep.subr.bf16.mxu1 %v2320_v14  ;;  %v202_v14 = vadd.f32 %v2058_v50, %v149_v10  ;;  %v1523_v10 = vpack.c.bf16 %v1299_v9, %v1298_v8 }
 0x673   :  { %1187 = vmatpush1.bf16.msra.mxu0 %v2323_v15  ;;  %1228 = vmatpush1.bf16.msra.mxu1 %v2326_v1 }
 0x674   :  { %1188 = vmatprep.subr.bf16.mxu0 %v2329_v2  ;;  %1229 = vmatprep.subr.bf16.mxu1 %v1741_v0  ;;  %v1290_v0 = vld [vmem:[#allocation5 + $0x10] sm:$0xff] }
 0x677   :  { %1189 = vmatpush1.bf16.msra.mxu0 %v1742_v57  ;;  %1230 = vmatpush1.bf16.msra.mxu1 %v1743_v27  ;;  %v1292_v27 = vld [vmem:[#allocation5 + $0x20] sm:$0xff] }
 0x678   :  { %1190 = vmatprep.subr.bf16.mxu0 %v1744_v56  ;;  %1231 = vmatprep.subr.bf16.mxu1 %v1745_v63  ;;  %v1293_v56 = vld [vmem:[#allocation5 + $0x28] sm:$0xff] }
 0x679   :  { %v1514_v63 = vpack.c.bf16 %v1293_v56, %v1292_v27 }
 0x67b   :  { %1191 = vmatpush1.bf16.msra.mxu0 %v1746_v47  ;;  %1232 = vmatpush1.bf16.msra.mxu1 %v1747_v3  ;;  %v1294_v47 = vld [vmem:[#allocation5 + $0x30] sm:$0xff]  ;;  %v1295_v3 = vld [vmem:[#allocation5 + $0x38] sm:$0xff] }
 0x67c   :  { %1192 = vmatprep.subr.bf16.mxu0 %v1748_v4  ;;  %1233 = vmatprep.subr.bf16.mxu1 %v1749_v5  ;;  %v1517_v4 = vpack.c.bf16 %v1295_v3, %v1294_v47  ;;  %v1296_v5 = vld [vmem:[#allocation5 + $0x40] sm:$0xff] }
 0x67f   :  { %1193 = vmatpush1.bf16.msra.mxu0 %v1750_v6  ;;  %1234 = vmatpush1.bf16.msra.mxu1 %v1751_v7  ;;  %v1297_v6 = vld [vmem:[#allocation5 + $0x48] sm:$0xff] }
 0x680   :  { %1507 = vmatprep.subr.bf16.mxu0 %v1831_v30  ;;  %v1520_v7 = vpack.c.bf16 %v1297_v6, %v1296_v5 }
 0x735   :  { %v1101_v12 = vpop.f32.mrb[24].mxu0  ;;  %v1142_v13 = vpop.f32.mrb[24].mxu1 }
 0x736   :  { %v1149_v15 = vadd.f32 %v1101_v12, %v201_v11  ;;  %v1103_v1 = vpop.f32.mrb[25].mxu0  ;;  %v1144_v2 = vpop.f32.mrb[25].mxu1  ;;  %v1151_v59 = vadd.f32 %v1142_v13, %v203_v21  ;;  %v1300_v11 = vld [vmem:[#allocation5 + $0x60] sm:$0xff]  ;;  %v1301_v12 = vld [vmem:[#allocation5 + $0x68] sm:$0xff]  ;;  %v1833_v13 = vmov 0.0  }
 0x737   :  { %v1150_v16 = vadd.f32 %v1103_v1, %v202_v14  ;;  %v1105_v31 = vpop.f32.mrb[26].mxu0  ;;  %v1146_v32 = vpop.f32.mrb[26].mxu1  ;;  %v1152_v45 = vadd.f32 %v1144_v2, %v204_v53  ;;  %v1526_v14 = vpack.c.bf16 %v1301_v12, %v1300_v11  ;;  %v1303_v1 = vld [vmem:[#allocation5 + $0x78] sm:$0xff] }
 0x738   :  { %v1448_v34 = vmul.f32 -1.442695, %v1149_v15  ;;  %v1106_v18 = vpop.f32.mrb[27].mxu0  ;;  %v1147_v35 = vpop.f32.mrb[27].mxu1  ;;  %v1450_v28 = vmul.f32 -1.442695, %v1151_v59 }
 0x739   :  { %v1449_v19 = vmul.f32 -1.442695, %v1150_v16  ;;  %v1302_v15 = vld [vmem:[#allocation5 + $0x70] sm:$0xff]  ;;  %v101_v16 = vpop.permute.xlu1 %100 }
 0x73a   :  { %1688 = vpow2.f32 %v1448_v34  ;;  %v1529_v2 = vpack.c.bf16 %v1303_v1, %v1302_v15  ;;  %v152_v31 = vmul.f32 %v2047_v42, %v101_v16  ;;  %v153_v32 = vmul.f32 %v2049_v43, %v101_v16 }
 0x73b   :  { %1690 = vpow2.f32 %v1449_v19  ;;  %v155_v43 = vmul.f32 %v2064_v55, %v101_v16 }
 0x73c   :  { %1692 = vtanh.f32 %v1152_v45  ;;  %v205_v17 = vadd.f32 %v2055_v48, %v152_v31  ;;  %v206_v35 = vadd.f32 %v2058_v50, %v153_v32 }
 0x73d   :  { %1694 = vpow2.f32 %v1450_v28  ;;  %v154_v28 = vmul.f32 %v2060_v52, %v101_v16  ;;  %v208_v50 = vadd.f32 %v2070_v40, %v155_v43 }
 0x73f   :  { %v207_v48 = vadd.f32 %v2067_v60, %v154_v28 }
 0x744   :  { %v1689_v58 = vpop.eup %1688 }
 0x745   :  { %v1162_v51 = vadd.f32 1.0, %v1689_v58  ;;  %v1691_v62 = vpop.eup %1690 }
 0x746   :  { %v1163_v36 = vadd.f32 1.0, %v1691_v62  ;;  %v1693_v37 = vpop.eup %1692 }
 0x747   :  { %1696 = vrcp.f32 %v1162_v51  ;;  %v1695_v39 = vpop.eup %1694 }
 0x748   :  { %1698 = vrcp.f32 %v1163_v36  ;;  %v1164_v61 = vadd.f32 1.0, %v1695_v39 }
 0x74a   :  { %1700 = vrcp.f32 %v1164_v61 }
 0x751   :  { %v1697_v41 = vpop.eup %1696 }
 0x752   :  { %v1173_v49 = vmul.f32 %v1697_v41, %v1693_v37  ;;  %v1699_v54 = vpop.eup %1698 }
 0x753   :  { %v1172_v44 = vmul.f32 %v1699_v54, %v2352_v24  ;;  %v1291_v24 = vld [vmem:[#allocation5 + $0x18] sm:$0xff] }
 0x754   :  { %v1701_v38 = vpop.eup %1700  ;;  %v1511_v57 = vpack.c.bf16 %v1291_v24, %v1290_v0 }
 0x755   :  { %v2385_v33 = vadd.f32 %v1173_v49, %v1172_v44 }
 0x757   :  { %1702 = vtanh.f32 %v2385_v33 }
 0x761   :  { %v1703_v46 = vpop.eup %1702 }
 0x762   :  { %v1176_v22 = vmul.f32 %v1703_v46, %v1701_v38 }
 0x764   :  { %v1177_v23 = vpack.c.bf16 %v1176_v22, %v1176_v22 }
 0x766   :  { %1211 = vmatmul.mubr.bf16.vlgmr.msra.gmra.mrb[28].mxu0 %v1177_v23  ;;  %1252 = vmatmul.mubr.bf16.vlgmr.msra.gmra.mrb[28].mxu1 %v1177_v23 }
 0x767   :  { %1509 = vmatpush3.bf16.msra.mxu0 %v1508_v29  ;;  %1504 = vmatprep.mubr.msk.f32.mxu0 %vm1832_vm0, %v1833_v13  ;;  %v1454_v29 = vld [vmem:[%s2417_s5] ss:$0 sm:$0xff] }
 0x768   :  { %1510 = vmatprep.subr.bf16.mxu0 %v1831_v30 }
 0x76b   :  { %1512 = vmatpush3.bf16.msra.mxu0 %v1511_v57 }
 0x76c   :  { %1513 = vmatprep.subr.bf16.mxu0 %v1831_v30 }
 0x76f   :  { %1515 = vmatpush3.bf16.msra.mxu0 %v1514_v63 }
 0x770   :  { %1516 = vmatprep.subr.bf16.mxu0 %v1831_v30 }
 0x773   :  { %1518 = vmatpush3.bf16.msra.mxu0 %v1517_v4 }
 0x774   :  { %1519 = vmatprep.subr.bf16.mxu0 %v1831_v30 }
 0x777   :  { %1521 = vmatpush3.bf16.msra.mxu0 %v1520_v7 }
 0x778   :  { %1522 = vmatprep.subr.bf16.mxu0 %v1831_v30 }
 0x77b   :  { %1524 = vmatpush3.bf16.msra.mxu0 %v1523_v10 }
 0x77c   :  { %1525 = vmatprep.subr.bf16.mxu0 %v1831_v30 }
 0x77f   :  { %1527 = vmatpush3.bf16.msra.mxu0 %v1526_v14 }
 0x780   :  { %1528 = vmatprep.subr.bf16.mxu0 %v1831_v30 }
 0x783   :  { %1530 = vmatpush3.bf16.msra.mxu0 %v1529_v2 }
 0x839   :  { %v1212_v34 = vpop.f32.mrb[28].mxu0  ;;  %v1253_v18 = vpop.f32.mrb[28].mxu1 }
 0x83a   :  { %v1260_v19 = vadd.f32 %v1212_v34, %v205_v17  ;;  %v1214_v20 = vpop.f32.mrb[29].mxu0  ;;  %v1255_v21 = vpop.f32.mrb[29].mxu1  ;;  %v1262_v36 = vadd.f32 %v1253_v18, %v207_v48 }
 0x83b   :  { %v1261_v59 = vadd.f32 %v1214_v20, %v206_v35  ;;  %v1216_v53 = vpop.f32.mrb[30].mxu0  ;;  %v1257_v45 = vpop.f32.mrb[30].mxu1  ;;  %v1263_v37 = vadd.f32 %v1255_v21, %v208_v50 }
 0x83c   :  { %v1451_v58 = vmul.f32 -1.442695, %v1260_v19  ;;  %v1217_v51 = vpop.f32.mrb[31].mxu0  ;;  %v1258_v62 = vpop.f32.mrb[31].mxu1  ;;  %v1453_v39 = vmul.f32 -1.442695, %v1262_v36 }
 0x83d   :  { %v1452_v42 = vmul.f32 -1.442695, %v1261_v59 }
 0x83e   :  { %1704 = vpow2.f32 %v1451_v58 }
 0x83f   :  { %1706 = vpow2.f32 %v1452_v42 }
 0x840   :  { %1708 = vtanh.f32 %v1263_v37 }
 0x841   :  { %1710 = vpow2.f32 %v1453_v39 }
 0x848   :  { %v1705_v41 = vpop.eup %1704 }
 0x849   :  { %v1273_v49 = vadd.f32 1.0, %v1705_v41  ;;  %v1707_v54 = vpop.eup %1706 }
 0x84a   :  { %v1274_v52 = vadd.f32 1.0, %v1707_v54  ;;  %v1709_v61 = vpop.eup %1708 }
 0x84b   :  { %1712 = vrcp.f32 %v1273_v49  ;;  %v1711_v44 = vpop.eup %1710 }
 0x84c   :  { %1714 = vrcp.f32 %v1274_v52  ;;  %v1275_v60 = vadd.f32 1.0, %v1711_v44 }
 0x84e   :  { %1716 = vrcp.f32 %v1275_v60 }
 0x855   :  { %v1713_v38 = vpop.eup %1712 }
 0x856   :  { %v1284_v55 = vmul.f32 %v1713_v38, %v1709_v61  ;;  %v1715_v46 = vpop.eup %1714 }
 0x857   :  { %v1283_v22 = vmul.f32 %v1715_v46, %v2385_v33 }
 0x858   :  { %v1717_v40 = vpop.eup %1716 }
 0x859   :  { %v1285_v23 = vadd.f32 %v1284_v55, %v1283_v22 }
 0x85b   :  { %1718 = vtanh.f32 %v1285_v23 }
 0x865   :  { %v1719_v25 = vpop.eup %1718 }
 0x866   :  { %v1287_v26 = vmul.f32 %v1719_v25, %v1717_v40 }
 0x868   :  { %1505 = vmatmul.mubr.f32.vlgmr.msra.gmra.mrb[32].mxu0 %v1287_v26 }
 0x93b   :  { %v1377_v30 = vpop.f32.mrb[32].mxu0 }
 0x93c   :  { %v1378_v0 = vadd.f32 %v1454_v29, %v1377_v30  ;;  %v1506_v24 = vpop.f32.mrb[33].mxu0 }
 0x93e   :  { %1381 = vst [vmem:[#allocation7] sm:$0xff] %v1378_v0 }
 0x93f   :  { %1807 = shalt.err (!%p1804_p6)
}
 0x940   :  { %s1808_s22 = scalar_lea.hbm %s2418_s6, 128 }
 0x941   :  { %p1809_p7 = scmp.ne.s32.totalorder %s2418_s6, %s1808_s22  ;;  %p1812_p8 = scmp.lt.u32.totalorder %s1808_s22, %s2418_s6 }
 0x943   :  { %p1814_p9 = pnand %p1812_p8, %p1809_p7 }
 0x945   :  { %1817 = shalt.err (!%p1814_p9)
}
 0x946   :  { %1391 = dma.vmem_to_hbm [thread:$0]  %s1389_s19, 128, %s2418_s6, [#allocation4]  }
 0x947   :  { %1822 = dma.done.wait [#allocation4], 128  }
 0x948   :  { %1823 = vsyncadd [#allocation4], 4294967168 }
 0x949   :  { %1395 = vsyncpa [#allocation3], 1 }
 0x94a   :  { %1396 = vsyncpa [#allocation6], 1 }
 0x94b   :  { %1397 = vsyncpa [#allocation4], 1 }

</bundles_post_ra>
